<compile_context>
chip_gen: v6e
topology: v6e:2x2x1
jax: 0.10.0
libtpu: 0.0.40
codegen_flags: <defaults>
</compile_context>

<pallas_src>
import functools
import math

import jax
import jax.numpy as jnp
import numpy as np
from jax.experimental import pallas as pl
from jax.experimental.pallas import tpu as pltpu


def _attention_kernel(x_ref, g_ref, b_ref, wq_ref, wk_ref, wv_ref, wo_ref, o_ref, *, eps):
    """One grid step = (one batch element) x (one block of heads).

    Block shapes:
      x_ref            : (1, N, D)    f32
      g_ref / b_ref    : (1, D)       f32
      wq/wk/wv_ref     : (hb, D, dh)  bf16   (softmax scale already folded into wq)
      wo_ref           : (hb, dh, D)  bf16
      o_ref            : (1, N, D)    f32    (accumulated across head blocks)
    """
    hg = pl.program_id(1)

    # ---- LayerNorm in f32 on the VPU (recomputed per head block: trivial VPU cost). ----
    x = x_ref[0]                                                   # (N, D)
    mean = jnp.mean(x, axis=-1, keepdims=True)
    xc = x - mean
    var = jnp.mean(xc * xc, axis=-1, keepdims=True)
    xn = (xc * jax.lax.rsqrt(var + eps)) * g_ref[...] + b_ref[...]

    hb = wq_ref.shape[0]
    # bf16 MXU operand, broadcast once to a heads-leading layout (no 16/64-lane slicing).
    xh = jnp.broadcast_to(xn.astype(jnp.bfloat16)[None], (hb,) + xn.shape)   # (hb, N, D)

    # ---- Per-head-block QKV projections: batched bf16 MXU matmuls with K = D. ----
    q = jnp.einsum('hnd,hdk->hnk', xh, wq_ref[...], preferred_element_type=jnp.float32)
    k = jnp.einsum('hnd,hdk->hnk', xh, wk_ref[...], preferred_element_type=jnp.float32)
    v = jnp.einsum('hnd,hdk->hnk', xh, wv_ref[...], preferred_element_type=jnp.float32)

    # ---- Scaled dot-product attention (scale folded into wq; softmax in f32). ----
    s = jnp.einsum('hnk,hmk->hnm', q.astype(jnp.bfloat16), k.astype(jnp.bfloat16),
                   preferred_element_type=jnp.float32)             # (hb, N, N)
    s = s - jnp.max(s, axis=-1, keepdims=True)
    e = jnp.exp(s)
    attn = e * pl.reciprocal(jnp.sum(e, axis=-1, keepdims=True), approx=True)

    o_h = jnp.einsum('hnm,hmk->hnk', attn.astype(jnp.bfloat16), v.astype(jnp.bfloat16),
                     preferred_element_type=jnp.float32)           # (hb, N, dh)

    # ---- Partial output projection for this head block (no concatenate needed). ----
    part = jnp.einsum('hnk,hkd->hnd', o_h.astype(jnp.bfloat16), wo_ref[...],
                      preferred_element_type=jnp.float32)          # (hb, N, D)
    part = jnp.sum(part, axis=0)                                   # (N, D)

    # ---- Accumulate across head blocks into the resident output block. ----
    @pl.when(hg == 0)
    def _():
        o_ref[...] = jnp.zeros_like(o_ref)

    o_ref[0] += part


def attention_pallas(x, gamma, beta, w_qkv, w_out, *, heads, dim_head, eps=1e-5,
                     head_block=None):
    B, N, D = x.shape
    inner = heads * dim_head
    scale = dim_head ** (-0.5)
    assert w_qkv.shape == (D, 3 * inner) and w_out.shape == (inner, D)

    if head_block is None:
        head_block = math.gcd(heads, 4)      # small head blocks keep the resident set small
    assert heads % head_block == 0
    num_hg = heads // head_block

    # Wrapper-side (one-time) weight prep: per-head layout, bf16, scale folded into q.
    wq, wk, wv = jnp.split(w_qkv, 3, axis=1)                        # (D, inner) each

    def to_heads(w):                                                # (D, H*dh) -> (H, D, dh)
        return w.reshape(D, heads, dim_head).transpose(1, 0, 2)

    wq_h = (to_heads(wq) * scale).astype(jnp.bfloat16)              # fold softmax scale
    wk_h = to_heads(wk).astype(jnp.bfloat16)
    wv_h = to_heads(wv).astype(jnp.bfloat16)
    wo_h = w_out.reshape(heads, dim_head, D).astype(jnp.bfloat16)   # (H, dh, D)

    gamma2d = gamma.reshape(1, D).astype(jnp.float32)
    beta2d = beta.reshape(1, D).astype(jnp.float32)

    kernel = functools.partial(_attention_kernel, eps=eps)

    return pl.pallas_call(
        kernel,
        out_shape=jax.ShapeDtypeStruct((B, N, D), jnp.float32),
        grid_spec=pltpu.PrefetchScalarGridSpec(
            num_scalar_prefetch=0,
            grid=(B, num_hg),
            in_specs=[
                pl.BlockSpec((1, N, D), lambda b, g: (b, 0, 0)),                   # x
                pl.BlockSpec((1, D), lambda b, g: (0, 0)),                         # gamma
                pl.BlockSpec((1, D), lambda b, g: (0, 0)),                         # beta
                pl.BlockSpec((head_block, D, dim_head), lambda b, g: (g, 0, 0)),   # wq
                pl.BlockSpec((head_block, D, dim_head), lambda b, g: (g, 0, 0)),   # wk
                pl.BlockSpec((head_block, D, dim_head), lambda b, g: (g, 0, 0)),   # wv
                pl.BlockSpec((head_block, dim_head, D), lambda b, g: (g, 0, 0)),   # w_out
            ],
            out_specs=pl.BlockSpec((1, N, D), lambda b, g: (b, 0, 0)),
        ),
        compiler_params=pltpu.CompilerParams(
            dimension_semantics=("parallel", "arbitrary"),   # B -> megacore; heads -> reduce
            vmem_limit_bytes=32 * 1024 * 1024,
        ),
    )(x, gamma2d, beta2d, wq_h, wk_h, wv_h, wo_h)


def attention_ref(x, gamma, beta, w_qkv, w_out, *, heads, dim_head, eps=1e-5):
    """Pure-JAX f32 reference mirroring the PyTorch forward exactly."""
    B, N, D = x.shape
    inner = heads * dim_head
    scale = dim_head ** (-0.5)
    mean = jnp.mean(x, axis=-1, keepdims=True)
    var = jnp.mean((x - mean) ** 2, axis=-1, keepdims=True)
    xn = (x - mean) / jnp.sqrt(var + eps) * gamma + beta
    qkv = xn @ w_qkv                                                # (B, N, 3*inner)
    q, k, v = jnp.split(qkv, 3, axis=-1)

    def to_heads(t):                                                # 'b n (h d) -> b h n d'
        return t.reshape(B, N, heads, dim_head).transpose(0, 2, 1, 3)

    q, k, v = map(to_heads, (q, k, v))
    dots = jnp.einsum('bhnd,bhmd->bhnm', q, k) * scale
    attn = jax.nn.softmax(dots, axis=-1)
    out = jnp.einsum('bhnm,bhmd->bhnd', attn, v)
    out = out.transpose(0, 2, 1, 3).reshape(B, N, inner)            # 'b h n d -> b n (h d)'
    return out @ w_out


if __name__ == "__main__":
    # Small but lane/sublane-friendly shapes: dim=128, module-default heads=8, dim_head=64.
    B, N, D = 2, 64, 128
    heads, dim_head = 8, 64
    inner = heads * dim_head

    key = jax.random.PRNGKey(0)
    kx, kqkv, kout = jax.random.split(key, 3)

    x = jax.random.normal(kx, (B, N, D), dtype=jnp.float32)

    # nn.Linear(dim, 3*inner).weight is (3*inner, dim); we store its transpose so fwd is x @ W.
    w_qkv = jax.random.normal(kqkv, (D, 3 * inner), dtype=jnp.float32) / np.sqrt(D)
    w_out = jax.random.normal(kout, (inner, D), dtype=jnp.float32) / np.sqrt(inner)
    gamma = jnp.ones((D,), dtype=jnp.float32)    # LayerNorm weight
    beta = jnp.zeros((D,), dtype=jnp.float32)    # LayerNorm bias

    out = attention_pallas(x, gamma, beta, w_qkv, w_out, heads=heads, dim_head=dim_head)
    out = jax.block_until_ready(out)

    ref = attention_ref(x, gamma, beta, w_qkv, w_out, heads=heads, dim_head=dim_head)
    # bf16 MXU operands => loosened tolerance vs. the f32 reference.
    np.testing.assert_allclose(np.asarray(out), np.asarray(ref), rtol=5e-2, atol=5e-2)

    print("KERNEL_OK")
</pallas_src>

<mosaic_0001>
module attributes {stable_mosaic.version = 11 : i64} {
  func.func @_attention_kernel(%arg0: i32, %arg1: i32, %arg2: memref<1x64x128xf32, #tpu.memory_space<vmem>>, %arg3: memref<1x128xf32, #tpu.memory_space<vmem>>, %arg4: memref<1x128xf32, #tpu.memory_space<vmem>>, %arg5: memref<4x128x64xbf16, #tpu.memory_space<vmem>>, %arg6: memref<4x128x64xbf16, #tpu.memory_space<vmem>>, %arg7: memref<4x128x64xbf16, #tpu.memory_space<vmem>>, %arg8: memref<4x64x128xbf16, #tpu.memory_space<vmem>>, %arg9: memref<1x64x128xf32, #tpu.memory_space<vmem>>) attributes {dimension_semantics = [#tpu.dimension_semantics<parallel>, #tpu.dimension_semantics<arbitrary>], iteration_bounds = array<i64: 2, 2>, scalar_prefetch = 0 : i64, scratch_operands = 0 : i64, tpu.core_type = #tpu.core_type<tc>, window_params = [{transform_indices = @transform_0, window_bounds = array<i64: 1, 64, 128>}, {pipeline_mode = #tpu.pipeline_mode<synchronous>, transform_indices = @transform_1, window_bounds = array<i64: 1, 128>}, {pipeline_mode = #tpu.pipeline_mode<synchronous>, transform_indices = @transform_2, window_bounds = array<i64: 1, 128>}, {transform_indices = @transform_3, window_bounds = array<i64: 4, 128, 64>}, {transform_indices = @transform_4, window_bounds = array<i64: 4, 128, 64>}, {transform_indices = @transform_5, window_bounds = array<i64: 4, 128, 64>}, {transform_indices = @transform_6, window_bounds = array<i64: 4, 64, 128>}, {transform_indices = @transform_7, window_bounds = array<i64: 1, 64, 128>}]} {
    %c0 = arith.constant 0 : index
    %c0_0 = arith.constant 0 : index
    %c0_1 = arith.constant 0 : index
    %0 = vector.load %arg2[%c0, %c0_0, %c0_1] : memref<1x64x128xf32, #tpu.memory_space<vmem>>, vector<1x64x128xf32>
    %1 = vector.shape_cast %0 : vector<1x64x128xf32> to vector<64x128xf32>
    %cst = arith.constant dense<0.000000e+00> : vector<64xf32>
    %2 = vector.multi_reduction <add>, %1, %cst [1] : vector<64x128xf32> to vector<64xf32>
    %3 = vector.shape_cast %2 : vector<64xf32> to vector<64x1xf32>
    %cst_2 = arith.constant 1.280000e+02 : f32
    %4 = vector.broadcast %cst_2 : f32 to vector<64x1xf32>
    %5 = arith.divf %3, %4 : vector<64x1xf32>
    %6 = vector.broadcast %5 : vector<64x1xf32> to vector<64x128xf32>
    %7 = arith.subf %1, %6 : vector<64x128xf32>
    %8 = arith.mulf %7, %7 : vector<64x128xf32>
    %cst_3 = arith.constant dense<0.000000e+00> : vector<64xf32>
    %9 = vector.multi_reduction <add>, %8, %cst_3 [1] : vector<64x128xf32> to vector<64xf32>
    %10 = vector.shape_cast %9 : vector<64xf32> to vector<64x1xf32>
    %cst_4 = arith.constant 1.280000e+02 : f32
    %11 = vector.broadcast %cst_4 : f32 to vector<64x1xf32>
    %12 = arith.divf %10, %11 : vector<64x1xf32>
    %cst_5 = arith.constant 9.99999974E-6 : f32
    %13 = vector.broadcast %cst_5 : f32 to vector<64x1xf32>
    %14 = arith.addf %12, %13 : vector<64x1xf32>
    %15 = math.rsqrt %14 : vector<64x1xf32>
    %16 = vector.broadcast %15 : vector<64x1xf32> to vector<64x128xf32>
    %17 = arith.mulf %7, %16 : vector<64x128xf32>
    %c0_6 = arith.constant 0 : index
    %c0_7 = arith.constant 0 : index
    %18 = vector.load %arg3[%c0_6, %c0_7] : memref<1x128xf32, #tpu.memory_space<vmem>>, vector<1x128xf32>
    %19 = vector.broadcast %18 : vector<1x128xf32> to vector<64x128xf32>
    %20 = arith.mulf %17, %19 : vector<64x128xf32>
    %c0_8 = arith.constant 0 : index
    %c0_9 = arith.constant 0 : index
    %21 = vector.load %arg4[%c0_8, %c0_9] : memref<1x128xf32, #tpu.memory_space<vmem>>, vector<1x128xf32>
    %22 = vector.broadcast %21 : vector<1x128xf32> to vector<64x128xf32>
    %23 = arith.addf %20, %22 : vector<64x128xf32>
    %24 = arith.truncf %23 : vector<64x128xf32> to vector<64x128xbf16>
    %25 = vector.shape_cast %24 : vector<64x128xbf16> to vector<1x64x128xbf16>
    %26 = vector.shape_cast %25 : vector<1x64x128xbf16> to vector<1x64x128xbf16>
    %27 = vector.broadcast %26 : vector<1x64x128xbf16> to vector<4x64x128xbf16>
    %c0_10 = arith.constant 0 : index
    %c0_11 = arith.constant 0 : index
    %c0_12 = arith.constant 0 : index
    %28 = vector.load %arg5[%c0_10, %c0_11, %c0_12] : memref<4x128x64xbf16, #tpu.memory_space<vmem>>, vector<4x128x64xbf16>
    "tpu.trace_start"() <{level = 10 : i32, message = "hnd,hdk->hnk"}> : () -> ()
    %cst_13 = arith.constant dense<0.000000e+00> : vector<4x64x64xf32>
    %29 = tpu.matmul %27, %28, %cst_13 {dimension_numbers = #tpu.dot_dimension_numbers<[2], [1], [1], [2], [0, 0, 0, 1, 1, 2], [0], [0]>} : vector<4x64x128xbf16>, vector<4x128x64xbf16>, vector<4x64x64xf32> -> vector<4x64x64xf32>
    "tpu.trace_stop"() : () -> ()
    %c0_14 = arith.constant 0 : index
    %c0_15 = arith.constant 0 : index
    %c0_16 = arith.constant 0 : index
    %30 = vector.load %arg6[%c0_14, %c0_15, %c0_16] : memref<4x128x64xbf16, #tpu.memory_space<vmem>>, vector<4x128x64xbf16>
    "tpu.trace_start"() <{level = 10 : i32, message = "hnd,hdk->hnk"}> : () -> ()
    %cst_17 = arith.constant dense<0.000000e+00> : vector<4x64x64xf32>
    %31 = tpu.matmul %27, %30, %cst_17 {dimension_numbers = #tpu.dot_dimension_numbers<[2], [1], [1], [2], [0, 0, 0, 1, 1, 2], [0], [0]>} : vector<4x64x128xbf16>, vector<4x128x64xbf16>, vector<4x64x64xf32> -> vector<4x64x64xf32>
    "tpu.trace_stop"() : () -> ()
    %c0_18 = arith.constant 0 : index
    %c0_19 = arith.constant 0 : index
    %c0_20 = arith.constant 0 : index
    %32 = vector.load %arg7[%c0_18, %c0_19, %c0_20] : memref<4x128x64xbf16, #tpu.memory_space<vmem>>, vector<4x128x64xbf16>
    "tpu.trace_start"() <{level = 10 : i32, message = "hnd,hdk->hnk"}> : () -> ()
    %cst_21 = arith.constant dense<0.000000e+00> : vector<4x64x64xf32>
    %33 = tpu.matmul %27, %32, %cst_21 {dimension_numbers = #tpu.dot_dimension_numbers<[2], [1], [1], [2], [0, 0, 0, 1, 1, 2], [0], [0]>} : vector<4x64x128xbf16>, vector<4x128x64xbf16>, vector<4x64x64xf32> -> vector<4x64x64xf32>
    "tpu.trace_stop"() : () -> ()
    %34 = arith.truncf %29 : vector<4x64x64xf32> to vector<4x64x64xbf16>
    %35 = arith.truncf %31 : vector<4x64x64xf32> to vector<4x64x64xbf16>
    "tpu.trace_start"() <{level = 10 : i32, message = "hnk,hmk->hnm"}> : () -> ()
    %cst_22 = arith.constant dense<0.000000e+00> : vector<4x64x64xf32>
    %36 = tpu.matmul %34, %35, %cst_22 {dimension_numbers = #tpu.dot_dimension_numbers<[2], [2], [1], [1], [0, 0, 0, 1, 1, 1], [0], [0]>} : vector<4x64x64xbf16>, vector<4x64x64xbf16>, vector<4x64x64xf32> -> vector<4x64x64xf32>
    "tpu.trace_stop"() : () -> ()
    %cst_23 = arith.constant dense<0xFF800000> : vector<4x64xf32>
    %37 = vector.multi_reduction <maximumf>, %36, %cst_23 [2] : vector<4x64x64xf32> to vector<4x64xf32>
    %38 = vector.shape_cast %37 : vector<4x64xf32> to vector<4x64x1xf32>
    %39 = vector.broadcast %38 : vector<4x64x1xf32> to vector<4x64x64xf32>
    %40 = arith.subf %36, %39 : vector<4x64x64xf32>
    %41 = math.exp %40 : vector<4x64x64xf32>
    %cst_24 = arith.constant dense<0.000000e+00> : vector<4x64xf32>
    %42 = vector.multi_reduction <add>, %41, %cst_24 [2] : vector<4x64x64xf32> to vector<4x64xf32>
    %43 = vector.shape_cast %42 : vector<4x64xf32> to vector<4x64x1xf32>
    %44 = tpu.reciprocal %43 {approx = true} : vector<4x64x1xf32> -> vector<4x64x1xf32>
    %45 = vector.broadcast %44 : vector<4x64x1xf32> to vector<4x64x64xf32>
    %46 = arith.mulf %41, %45 : vector<4x64x64xf32>
    %47 = arith.truncf %46 : vector<4x64x64xf32> to vector<4x64x64xbf16>
    %48 = arith.truncf %33 : vector<4x64x64xf32> to vector<4x64x64xbf16>
    "tpu.trace_start"() <{level = 10 : i32, message = "hnm,hmk->hnk"}> : () -> ()
    %cst_25 = arith.constant dense<0.000000e+00> : vector<4x64x64xf32>
    %49 = tpu.matmul %47, %48, %cst_25 {dimension_numbers = #tpu.dot_dimension_numbers<[2], [1], [1], [2], [0, 0, 0, 1, 1, 2], [0], [0]>} : vector<4x64x64xbf16>, vector<4x64x64xbf16>, vector<4x64x64xf32> -> vector<4x64x64xf32>
    "tpu.trace_stop"() : () -> ()
    %50 = arith.truncf %49 : vector<4x64x64xf32> to vector<4x64x64xbf16>
    %c0_26 = arith.constant 0 : index
    %c0_27 = arith.constant 0 : index
    %c0_28 = arith.constant 0 : index
    %51 = vector.load %arg8[%c0_26, %c0_27, %c0_28] : memref<4x64x128xbf16, #tpu.memory_space<vmem>>, vector<4x64x128xbf16>
    "tpu.trace_start"() <{level = 10 : i32, message = "hnk,hkd->hnd"}> : () -> ()
    %cst_29 = arith.constant dense<0.000000e+00> : vector<4x64x128xf32>
    %52 = tpu.matmul %50, %51, %cst_29 {dimension_numbers = #tpu.dot_dimension_numbers<[2], [1], [1], [2], [0, 0, 0, 1, 1, 2], [0], [0]>} : vector<4x64x64xbf16>, vector<4x64x128xbf16>, vector<4x64x128xf32> -> vector<4x64x128xf32>
    "tpu.trace_stop"() : () -> ()
    %cst_30 = arith.constant dense<0.000000e+00> : vector<64x128xf32>
    %53 = vector.multi_reduction <add>, %52, %cst_30 [0] : vector<4x64x128xf32> to vector<64x128xf32>
    %c0_i32 = arith.constant 0 : i32
    %54 = arith.cmpi eq, %arg1, %c0_i32 : i32
    %55 = arith.extui %54 : i1 to i32
    %c0_i32_31 = arith.constant 0 : i32
    %56 = arith.cmpi ne, %55, %c0_i32_31 : i32
    scf.if %56 {
      %cst_38 = arith.constant 0.000000e+00 : f32
      %63 = vector.broadcast %cst_38 : f32 to vector<1x64x128xf32>
      %c0_39 = arith.constant 0 : index
      %c0_40 = arith.constant 0 : index
      %c0_41 = arith.constant 0 : index
      %64 = vector.load %arg9[%c0_39, %c0_40, %c0_41] : memref<1x64x128xf32, #tpu.memory_space<vmem>>, vector<1x64x128xf32>
      tpu.vector_store %arg9[%c0_39, %c0_40, %c0_41], %63 {strides = array<i32>} : memref<1x64x128xf32, #tpu.memory_space<vmem>>, vector<1x64x128xf32>,
    } else {
    }
    %c0_32 = arith.constant 0 : index
    %c0_33 = arith.constant 0 : index
    %c0_34 = arith.constant 0 : index
    %57 = vector.load %arg9[%c0_32, %c0_33, %c0_34] : memref<1x64x128xf32, #tpu.memory_space<vmem>>, vector<1x64x128xf32>
    %58 = vector.shape_cast %57 : vector<1x64x128xf32> to vector<64x128xf32>
    %59 = arith.addf %58, %53 : vector<64x128xf32>
    %c0_35 = arith.constant 0 : index
    %c0_36 = arith.constant 0 : index
    %c0_37 = arith.constant 0 : index
    %60 = vector.load %arg9[%c0_35, %c0_36, %c0_37] : memref<1x64x128xf32, #tpu.memory_space<vmem>>, vector<1x64x128xf32>
    %61 = vector.shape_cast %60 : vector<1x64x128xf32> to vector<64x128xf32>
    %62 = vector.shape_cast %59 : vector<64x128xf32> to vector<1x64x128xf32>
    tpu.vector_store %arg9[%c0_35, %c0_36, %c0_37], %62 {strides = array<i32>} : memref<1x64x128xf32, #tpu.memory_space<vmem>>, vector<1x64x128xf32>,
    return
  }
  func.func @transform_0(%arg0: i32, %arg1: i32) -> (i32, i32, i32) {
    %c0_i32 = arith.constant 0 : i32
    %c0_i32_0 = arith.constant 0 : i32
    %c0_i32_1 = arith.constant 0 : i32
    return %arg0, %c0_i32, %c0_i32_0 : i32, i32, i32
  }
  func.func @transform_1(%arg0: i32, %arg1: i32) -> (i32, i32) {
    %c0_i32 = arith.constant 0 : i32
    %c0_i32_0 = arith.constant 0 : i32
    %c0_i32_1 = arith.constant 0 : i32
    return %c0_i32, %c0_i32_0 : i32, i32
  }
  func.func @transform_2(%arg0: i32, %arg1: i32) -> (i32, i32) {
    %c0_i32 = arith.constant 0 : i32
    %c0_i32_0 = arith.constant 0 : i32
    %c0_i32_1 = arith.constant 0 : i32
    return %c0_i32, %c0_i32_0 : i32, i32
  }
  func.func @transform_3(%arg0: i32, %arg1: i32) -> (i32, i32, i32) {
    %c0_i32 = arith.constant 0 : i32
    %c0_i32_0 = arith.constant 0 : i32
    %c0_i32_1 = arith.constant 0 : i32
    return %arg1, %c0_i32, %c0_i32_0 : i32, i32, i32
  }
  func.func @transform_4(%arg0: i32, %arg1: i32) -> (i32, i32, i32) {
    %c0_i32 = arith.constant 0 : i32
    %c0_i32_0 = arith.constant 0 : i32
    %c0_i32_1 = arith.constant 0 : i32
    return %arg1, %c0_i32, %c0_i32_0 : i32, i32, i32
  }
  func.func @transform_5(%arg0: i32, %arg1: i32) -> (i32, i32, i32) {
    %c0_i32 = arith.constant 0 : i32
    %c0_i32_0 = arith.constant 0 : i32
    %c0_i32_1 = arith.constant 0 : i32
    return %arg1, %c0_i32, %c0_i32_0 : i32, i32, i32
  }
  func.func @transform_6(%arg0: i32, %arg1: i32) -> (i32, i32, i32) {
    %c0_i32 = arith.constant 0 : i32
    %c0_i32_0 = arith.constant 0 : i32
    %c0_i32_1 = arith.constant 0 : i32
    return %arg1, %c0_i32, %c0_i32_0 : i32, i32, i32
  }
  func.func @transform_7(%arg0: i32, %arg1: i32) -> (i32, i32, i32) {
    %c0_i32 = arith.constant 0 : i32
    %c0_i32_0 = arith.constant 0 : i32
    %c0_i32_1 = arith.constant 0 : i32
    return %arg0, %c0_i32, %c0_i32_0 : i32, i32, i32
  }
}

</mosaic_0001>

<bundles_post_ra>
// kernel: tpu_custom_call.1
= control target key start
LH: loop header
LB: loop body
LE: loop exit
PB: predicated region body
PF: predicated region fallthrough
CT: control target
= control target key end

     0   :  { %12 = vsyncpa [#allocation3], 0  ;;  %s6176_s0 = inlined_call_operand.vmem [shape: f32[2,64,128], index: 0, kind: input, shape index: {}]   ;;  %s6177_s1 = inlined_call_operand.vmem [shape: f32[1,128], index: 1, kind: input, shape index: {}]   ;;  %s6178_s2 = inlined_call_operand.vmem [shape: f32[1,128], index: 2, kind: input, shape index: {}]   ;;  %s6179_s3 = inlined_call_operand.vmem [shape: bf16[8,128,64], index: 3, kind: input, shape index: {}]   ;;  %s6180_s4 = inlined_call_operand.vmem [shape: bf16[8,128,64], index: 4, kind: input, shape index: {}]   ;;  %s6181_s5 = inlined_call_operand.vmem [shape: bf16[8,128,64], index: 5, kind: input, shape index: {}]   ;;  %s6182_s6 = inlined_call_operand.vmem [shape: bf16[8,64,128], index: 6, kind: input, shape index: {}]   ;;  %s6183_s7 = inlined_call_operand.hbm [shape: f32[2,64,128], index: 7, kind: output, shape index: {}]  }
   0x1   :  { %14 = vsyncpa [#allocation3 + $0x1], 0  ;;  %s5195_s24 = smov 0   ;;  %s5197_s25 = smov 0  }
   0x2   :  { %s5199_s26 = smov 0   ;;  %s5201_s27 = smov 0  }
   0x3   :  { %s5203_s28 = smov 0   ;;  %s5205_s29 = smov 0  }
   0x4   :  { %s5207_s30 = smov 0   ;;  %s5209_s8 = smov 0  }
   0x5 LB: > { %s3797_s9 = sadd.s32 4294967295, %s5149_s8   ;;  %s3798_s10 = sadd.s32 4294967294, %s5149_s8   ;;  %s5149_s8 = sphi %s5209_s8, %s20_s8   ;;  %s5145_s30 = sphi %s5207_s30, %s6194_s30   ;;  %s5141_s29 = sphi %s5205_s29, %s6193_s29   ;;  %s5137_s28 = sphi %s5203_s28, %s6192_s28   ;;  %s5133_s27 = sphi %s5201_s27, %s6191_s27   ;;  %s5129_s26 = sphi %s5199_s26, %s6190_s26   ;;  %s5125_s25 = sphi %s5197_s25, %s6189_s25   ;;  %s5121_s24 = sphi %s5195_s24, %s6188_s24  }
   0x6   : > { %s29_s11 = sadd.s32 1, %s5141_s29  ;;  %s32_s12 = sadd.s32 1, %s5145_s30 }
   0x7   : > { %p30_p0 = scmp.ge.s32.totalorder %s29_s11, 2  ;;  %p221_p1 = scmp.ne.s32.totalorder %s5129_s26, %s5125_s25 }
   0x8   : > { %p222_p2 = scmp.eq.s32.totalorder %s3797_s9, 3  ;;  %p227_p4 = scmp.ne.s32.totalorder %s5125_s25, %s5121_s24 }
   0x9   : > { %s6196_s11 = smov (%p30_p0, %s29_s11), 0  ;;  %s6198_s12 = smov (!%p30_p0, %s32_s12), %s5145_s30 }
   0xa   : > { %p5244_p3 = por %p222_p2, %p221_p1  ;;  %p34_p5 = scmp.ge.s32.totalorder %s6198_s12, 2 }
   0xb   : > { %p228_p6 = scmp.eq.s32.totalorder %s3798_s10, 3  ;;  %p3801_p7 = scmp.ge.s32.totalorder %s5149_s8, 1 }
   0xc   : > { %p300_p8 = scmp.lt.s32.totalorder %s5149_s8, 5  ;;  %s6200_s12 = smov (%p34_p5, %s6198_s12), 0 }
   0xd   : > { %p5254_p9 = por %p228_p6, %p227_p4  ;;  %s208_s15 = ssub.s32 %s5145_s30, %s6200_s12 }
   0xe   : > { %p301_p10 = pnand %p3801_p7, %p300_p8  ;;  %s211_s16 = sadd.s32 1, %s5129_s26 }
   0xf   : > { %p209_p11 = scmp.eq.s32.totalorder %s208_s15, 0  ;;  %p356_p12 = scmp.lt.s32.totalorder (!%p301_p10), %s5137_s28, 1 }
  0x10   : > { %304 = sbr.rel (%p301_p10) target bundleno = 1652 (0x674), region = 48  ;;  %s3805_s23 = sshll.u32 (!%p301_p10), %s5133_s27, 2 }
  0x11   : > { %s5262_s17 = scalar_select %p209_p11, %s5129_s26, %s211_s16  }
  0x12   : > { %p362_p13 = scmp.lt.s32.totalorder (!%p301_p10), %s3805_s23, 7  ;;  %p3979_p0 = scmp.ne.s32.totalorder (!%p301_p10), %s5133_s27, 0 }
  0x15   : > { %s357_s18 = scalar_select %p356_p12, %s5137_s28, 1  ;;  %vm2101_vm0 = vcmask 523264  }
  0x16   : > { %s6202_s23 = smov (!%p362_p13, %s3805_s23), 7 }
  0x17   : > { %s3985_s19 = sshll.u32 %s357_s18, 6  ;;  %s5295_s9 = sshll.u32 %s6202_s23, 6 }
  0x18   : > { %s360_s22 = scalar_lea.vmem %s6176_s0, %s3985_s19  ;;  %s5307_s16 = scalar_lea.vmem %s6179_s3, %s5295_s9 }
  0x19   : > { %v390_v0 = vld [vmem:[%s360_s22] sm:$0xff]  ;;  %v392_v1 = vld [vmem:[%s360_s22 + $0x10] sm:$0xff]  ;;  %v391_v2 = vld [vmem:[%s360_s22 + $0x8] sm:$0xff]  ;;  %s6184_s18 = sand.u32 1, %s5125_s25  }
  0x1a   : > { %398 = vadd.xlane.f32.xlu0 %v390_v0  ;;  %402 = vadd.xlane.f32.xlu1 %v392_v1  ;;  %v393_v3 = vld [vmem:[%s360_s22 + $0x18] sm:$0xff]  ;;  %v394_v4 = vld [vmem:[%s360_s22 + $0x20] sm:$0xff]  ;;  %v395_v5 = vld [vmem:[%s360_s22 + $0x28] sm:$0xff]  ;;  %s5328_s19 = sshll.u32 %s6184_s18, 6  ;;  %s5352_s18 = scalar_lea.vmem %s6181_s5, %s5295_s9 }
  0x1b   : > { %v396_v6 = vld [vmem:[%s360_s22 + $0x30] sm:$0xff]  ;;  %v397_v7 = vld [vmem:[%s360_s22 + $0x38] sm:$0xff]  ;;  %v4805_v44 = vld [vmem:[%s5307_s16 + $0x28] sm:$0xff]   ;;  %s5346_s22 = scalar_lea.vmem %s6180_s4, %s5295_s9 }
  0x1c   : > { %v4801_v38 = vld [vmem:[%s5307_s16 + $0x38] sm:$0xff]   ;;  %v4803_v42 = vld [vmem:[%s5307_s16 + $0x30] sm:$0xff]   ;;  %v4806_v45 = vld [vmem:[%s5307_s16 + $0x68] sm:$0xff]  }
  0x1d   : > { %v4802_v40 = vld [vmem:[%s5307_s16 + $0x78] sm:$0xff]   ;;  %4231 = vmatprep.subr.bf16.mxu0 %v4801_v38  ;;  %v4804_v43 = vld [vmem:[%s5307_s16 + $0x70] sm:$0xff]   ;;  %v4807_v46 = vld [vmem:[%s5307_s16 + $0x20] sm:$0xff]  }
  0x1e   : > { %400 = vadd.xlane.f32.xlu0 %v391_v2  ;;  %404 = vadd.xlane.f32.xlu1 %v393_v3  ;;  %v4808_v47 = vld [vmem:[%s5307_s16 + $0x60] sm:$0xff]   ;;  %v4809_v48 = vld [vmem:[%s5307_s16 + $0x18] sm:$0xff]   ;;  %v4811_v50 = vld [vmem:[%s5307_s16 + $0x10] sm:$0xff]  }
  0x1f   : > { %4255 = vmatprep.subr.bf16.mxu1 %v4802_v40  ;;  %4232 = vmatpush3.bf16.msra.mxu0 %v4801_v38  ;;  %v4810_v49 = vld [vmem:[%s5307_s16 + $0x58] sm:$0xff]   ;;  %v4812_v51 = vld [vmem:[%s5307_s16 + $0x50] sm:$0xff]   ;;  %v4813_v52 = vld [vmem:[%s5307_s16 + $0x8] sm:$0xff]  }
  0x20   : > { %4256 = vmatpush3.bf16.msra.mxu1 %v4802_v40  ;;  %4233 = vmatprep.subr.bf16.mxu0 %v4803_v42  ;;  %v4814_v53 = vld [vmem:[%s5307_s16 + $0x48] sm:$0xff]   ;;  %v4815_v54 = vld [vmem:[%s5307_s16] sm:$0xff]   ;;  %v5335_v56 = vld [vmem:[%s5307_s16 + $0xb8] sm:$0xff]  }
  0x21   : > { %4257 = vmatprep.subr.bf16.mxu1 %v4804_v43  ;;  %v4816_v55 = vld [vmem:[%s5307_s16 + $0x40] sm:$0xff]   ;;  %v5338_v57 = vld [vmem:[%s5307_s16 + $0xf8] sm:$0xff]  }
  0x22   : > { %406 = vadd.xlane.f32.xlu0 %v394_v4  ;;  %408 = vadd.xlane.f32.xlu1 %v395_v5 }
  0x23   : > { %4234 = vmatpush3.bf16.msra.mxu0 %v4803_v42 }
  0x24   : > { %4258 = vmatpush3.bf16.msra.mxu1 %v4804_v43  ;;  %4235 = vmatprep.subr.bf16.mxu0 %v4805_v44 }
  0x25   : > { %4259 = vmatprep.subr.bf16.mxu1 %v4806_v45 }
  0x26   : > { %410 = vadd.xlane.f32.xlu0 %v396_v6  ;;  %412 = vadd.xlane.f32.xlu1 %v397_v7 }
  0x27   : > { %4236 = vmatpush3.bf16.msra.mxu0 %v4805_v44 }
  0x28   : > { %4260 = vmatpush3.bf16.msra.mxu1 %v4806_v45  ;;  %4237 = vmatprep.subr.bf16.mxu0 %v4807_v46 }
  0x29   : > { %4261 = vmatprep.subr.bf16.mxu1 %v4808_v47 }
  0x2b   : > { %4238 = vmatpush3.bf16.msra.mxu0 %v4807_v46 }
  0x2c   : > { %4262 = vmatpush3.bf16.msra.mxu1 %v4808_v47  ;;  %4239 = vmatprep.subr.bf16.mxu0 %v4809_v48 }
  0x2d   : > { %4263 = vmatprep.subr.bf16.mxu1 %v4810_v49 }
  0x2f   : > { %4240 = vmatpush3.bf16.msra.mxu0 %v4809_v48 }
  0x30   : > { %4264 = vmatpush3.bf16.msra.mxu1 %v4810_v49  ;;  %4241 = vmatprep.subr.bf16.mxu0 %v4811_v50 }
  0x31   : > { %4265 = vmatprep.subr.bf16.mxu1 %v4812_v51 }
  0x33   : > { %4242 = vmatpush3.bf16.msra.mxu0 %v4811_v50  ;;  %v4820_v50 = vld [vmem:[%s5307_s16 + $0xf0] sm:$0xff]  }
  0x34   : > { %4266 = vmatpush3.bf16.msra.mxu1 %v4812_v51  ;;  %4243 = vmatprep.subr.bf16.mxu0 %v4813_v52 }
  0x35   : > { %4267 = vmatprep.subr.bf16.mxu1 %v4814_v53 }
  0x37   : > { %4244 = vmatpush3.bf16.msra.mxu0 %v4813_v52 }
  0x38   : > { %4268 = vmatpush3.bf16.msra.mxu1 %v4814_v53  ;;  %4245 = vmatprep.subr.bf16.mxu0 %v4815_v54 }
  0x39   : > { %4269 = vmatprep.subr.bf16.mxu1 %v4816_v55 }
  0x3b   : > { %4246 = vmatpush3.bf16.msra.mxu0 %v4815_v54 }
  0x3c   : > { %4270 = vmatpush3.bf16.msra.mxu1 %v4816_v55  ;;  %4279 = vmatprep.subr.bf16.mxu0 %v5335_v56 }
  0x3d   : > { %4303 = vmatprep.subr.bf16.mxu1 %v5338_v57 }
  0xa3   : > { %v399_v8 = vpop.xlane.xlu0 %398  ;;  %v403_v9 = vpop.xlane.xlu1 %402 }
  0xa4   : > { %v415_v10 = vmul.f32 0.0078125, %v399_v8  ;;  %v417_v11 = vmul.f32 0.0078125, %v403_v9 }
  0xa6   : > { %v5269_v12 = vsub.f32 %v390_v0, %v415_v10  ;;  %v5271_v13 = vsub.f32 %v392_v1, %v417_v11 }
  0xa7   : > { %v401_v14 = vpop.xlane.xlu0 %400  ;;  %v405_v15 = vpop.xlane.xlu1 %404 }
  0xa8   : > { %v416_v16 = vmul.f32 0.0078125, %v401_v14  ;;  %v431_v17 = vmul.f32 %v5269_v12, %v5269_v12  ;;  %v418_v18 = vmul.f32 0.0078125, %v405_v15  ;;  %v433_v21 = vmul.f32 %v5271_v13, %v5271_v13 }
  0xaa   : > { %v5275_v19 = vsub.f32 %v391_v2, %v416_v16  ;;  %439 = vadd.xlane.f32.xlu0 %v431_v17  ;;  %v5277_v20 = vsub.f32 %v393_v3, %v418_v18 }
  0xab   : > { %v407_v22 = vpop.xlane.xlu0 %406  ;;  %v409_v23 = vpop.xlane.xlu1 %408 }
  0xac   : > { %v419_v24 = vmul.f32 0.0078125, %v407_v22  ;;  %v432_v25 = vmul.f32 %v5275_v19, %v5275_v19  ;;  %v420_v26 = vmul.f32 0.0078125, %v409_v23  ;;  %v434_v29 = vmul.f32 %v5277_v20, %v5277_v20 }
  0xae   : > { %v5284_v27 = vsub.f32 %v394_v4, %v419_v24  ;;  %443 = vadd.xlane.f32.xlu0 %v433_v21  ;;  %441 = vadd.xlane.f32.xlu1 %v432_v25  ;;  %v5286_v28 = vsub.f32 %v395_v5, %v420_v26  ;;  %v3817_v24 = vld [vmem:[%s6177_s1] ss:$0 sm:$0xff] }
  0xaf   : > { %v411_v30 = vpop.xlane.xlu0 %410  ;;  %v413_v31 = vpop.xlane.xlu1 %412 }
  0xb0   : > { %v421_v32 = vmul.f32 0.0078125, %v411_v30  ;;  %v435_v33 = vmul.f32 %v5284_v27, %v5284_v27  ;;  %v422_v34 = vmul.f32 0.0078125, %v413_v31  ;;  %v436_v37 = vmul.f32 %v5286_v28, %v5286_v28  ;;  %v3818_v31 = vld [vmem:[%s6178_s2] ss:$0 sm:$0xff] }
  0xb2   : > { %v5297_v35 = vsub.f32 %v396_v6, %v421_v32  ;;  %445 = vadd.xlane.f32.xlu1 %v434_v29  ;;  %447 = vadd.xlane.f32.xlu0 %v435_v33  ;;  %v5299_v36 = vsub.f32 %v397_v7, %v422_v34 }
  0xb4   : > { %v437_v39 = vmul.f32 %v5297_v35, %v5297_v35  ;;  %v438_v41 = vmul.f32 %v5299_v36, %v5299_v36 }
  0xb6   : > { %449 = vadd.xlane.f32.xlu1 %v436_v37  ;;  %451 = vadd.xlane.f32.xlu0 %v437_v39 }
  0xba   : > { %453 = vadd.xlane.f32.xlu1 %v438_v41 }
 0x133   : > { %v440_v58 = vpop.xlane.xlu0 %439 }
 0x134   : > { %v455_v59 = vmul.f32 0.0078125, %v440_v58  ;;  %v4821_v58 = vld [vmem:[%s5307_s16 + $0xa8] sm:$0xff]  }
 0x136   : > { %v463_v60 = vadd.f32 1e-05, %v455_v59  ;;  %v4822_v59 = vld [vmem:[%s5307_s16 + $0xe8] sm:$0xff]  }
 0x137   : > { %v442_v61 = vpop.xlane.xlu1 %441  ;;  %v444_v62 = vpop.xlane.xlu0 %443 }
 0x138   : > { %4913 = vrsqrt.f32 %v463_v60  ;;  %v456_v63 = vmul.f32 0.0078125, %v442_v61  ;;  %v457_v0 = vmul.f32 0.0078125, %v444_v62  ;;  %v4825_v62 = vld [vmem:[%s5307_s16 + $0x98] sm:$0xff]  }
 0x13a   : > { %v464_v1 = vadd.f32 1e-05, %v456_v63  ;;  %v465_v2 = vadd.f32 1e-05, %v457_v0  ;;  %v4826_v63 = vld [vmem:[%s5307_s16 + $0xd8] sm:$0xff]   ;;  %v4827_v0 = vld [vmem:[%s5307_s16 + $0x90] sm:$0xff]  }
 0x13b   : > { %v446_v3 = vpop.xlane.xlu1 %445  ;;  %v448_v4 = vpop.xlane.xlu0 %447 }
 0x13c   : > { %4915 = vrsqrt.f32 %v464_v1  ;;  %v458_v5 = vmul.f32 0.0078125, %v446_v3  ;;  %v459_v6 = vmul.f32 0.0078125, %v448_v4  ;;  %v4828_v1 = vld [vmem:[%s5307_s16 + $0xd0] sm:$0xff]   ;;  %v4830_v3 = vld [vmem:[%s5307_s16 + $0xc8] sm:$0xff]   ;;  %v4831_v4 = vld [vmem:[%s5307_s16 + $0x80] sm:$0xff]  }
 0x13d   : > { %4917 = vrsqrt.f32 %v465_v2  ;;  %v4829_v2 = vld [vmem:[%s5307_s16 + $0x88] sm:$0xff]  }
 0x13e   : > { %v466_v7 = vadd.f32 1e-05, %v458_v5  ;;  %v467_v8 = vadd.f32 1e-05, %v459_v6  ;;  %v4832_v5 = vld [vmem:[%s5307_s16 + $0xc0] sm:$0xff]   ;;  %v4833_v6 = vld [vmem:[%s5346_s22 + $0x38] sm:$0xff]  }
 0x13f   : > { %v450_v9 = vpop.xlane.xlu1 %449  ;;  %v452_v10 = vpop.xlane.xlu0 %451 }
 0x140   : > { %4919 = vrsqrt.f32 %v466_v7  ;;  %v460_v11 = vmul.f32 0.0078125, %v450_v9  ;;  %v461_v14 = vmul.f32 0.0078125, %v452_v10  ;;  %v4834_v7 = vld [vmem:[%s5346_s22 + $0x78] sm:$0xff]   ;;  %v4836_v9 = vld [vmem:[%s5346_s22 + $0x70] sm:$0xff]   ;;  %v4837_v10 = vld [vmem:[%s5346_s22 + $0x28] sm:$0xff]  }
 0x141   : > { %4921 = vrsqrt.f32 %v467_v8  ;;  %v4835_v8 = vld [vmem:[%s5346_s22 + $0x30] sm:$0xff]  }
 0x142   : > { %v468_v15 = vadd.f32 1e-05, %v460_v11  ;;  %v469_v16 = vadd.f32 1e-05, %v461_v14  ;;  %v4838_v11 = vld [vmem:[%s5346_s22 + $0x68] sm:$0xff]   ;;  %v4839_v14 = vld [vmem:[%s5346_s22 + $0x20] sm:$0xff]  }
 0x143   : > { %v454_v17 = vpop.xlane.xlu1 %453 }
 0x144   : > { %4923 = vrsqrt.f32 %v468_v15  ;;  %v462_v18 = vmul.f32 0.0078125, %v454_v17  ;;  %v4840_v15 = vld [vmem:[%s5346_s22 + $0x60] sm:$0xff]   ;;  %v4842_v17 = vld [vmem:[%s5346_s22 + $0x58] sm:$0xff]  }
 0x145   : > { %v4914_v21 = vpop.eup %4913  ;;  %4925 = vrsqrt.f32 %v469_v16  ;;  %v4841_v16 = vld [vmem:[%s5346_s22 + $0x18] sm:$0xff]  }
 0x146   : > { %v479_v22 = vmul.f32 %v4914_v21, %v5269_v12  ;;  %v470_v23 = vadd.f32 1e-05, %v462_v18  ;;  %v4843_v18 = vld [vmem:[%s5346_s22 + $0x10] sm:$0xff]  }
 0x147   : > { %v4844_v21 = vld [vmem:[%s5346_s22 + $0x50] sm:$0xff]  }
 0x148   : > { %4927 = vrsqrt.f32 %v470_v23  ;;  %v494_v29 = vmul.f32 %v3817_v24, %v479_v22  ;;  %v4845_v22 = vld [vmem:[%s5346_s22 + $0x8] sm:$0xff]  }
 0x149   : > { %v4916_v25 = vpop.eup %4915  ;;  %v4846_v23 = vld [vmem:[%s5346_s22 + $0x48] sm:$0xff]  }
 0x14a   : > { %v4918_v26 = vpop.eup %4917  ;;  %v480_v30 = vmul.f32 %v4916_v25, %v5275_v19  ;;  %v509_v37 = vadd.f32 %v3818_v31, %v494_v29  ;;  %v4848_v25 = vld [vmem:[%s5346_s22 + $0x40] sm:$0xff]   ;;  %v4850_v29 = vld [vmem:[%s5346_s22 + $0xf8] sm:$0xff]  }
 0x14b   : > { %v481_v32 = vmul.f32 %v4918_v26, %v5271_v13  ;;  %v4849_v26 = vld [vmem:[%s5346_s22 + $0xb8] sm:$0xff]  }
 0x14c   : > { %v495_v33 = vmul.f32 %v3817_v24, %v480_v30  ;;  %v4851_v30 = vld [vmem:[%s5346_s22 + $0xb0] sm:$0xff]  }
 0x14d   : > { %v4920_v34 = vpop.eup %4919  ;;  %v496_v39 = vmul.f32 %v3817_v24, %v481_v32  ;;  %v4853_v32 = vld [vmem:[%s5346_s22 + $0xa8] sm:$0xff]  }
 0x14e   : > { %v4922_v12 = vpop.eup %4921  ;;  %v510_v38 = vadd.f32 %v3818_v31, %v495_v33  ;;  %v482_v40 = vmul.f32 %v4920_v34, %v5277_v20  ;;  %v4819_v20 = vld [vmem:[%s5307_s16 + $0xb0] sm:$0xff]   ;;  %v4854_v33 = vld [vmem:[%s5346_s22 + $0xe8] sm:$0xff]   ;;  %v4855_v34 = vld [vmem:[%s5346_s22 + $0xa0] sm:$0xff]  }
 0x14f   : > { %v483_v41 = vmul.f32 %v4922_v12, %v5284_v27  ;;  %v511_v46 = vadd.f32 %v3818_v31, %v496_v39  ;;  %v4856_v12 = vld [vmem:[%s5346_s22 + $0xe0] sm:$0xff]   ;;  %v4859_v39 = vld [vmem:[%s5346_s22 + $0x90] sm:$0xff]  }
 0x150   : > { %v5365_v42 = vpack.c.bf16 %v510_v38, %v509_v37  ;;  %v497_v19 = vmul.f32 %v3817_v24, %v482_v40  ;;  %v4857_v37 = vld [vmem:[%s5346_s22 + $0x98] sm:$0xff]   ;;  %v4860_v40 = vld [vmem:[%s5346_s22 + $0xd0] sm:$0xff]  }
 0x151   : > { %v4924_v43 = vpop.eup %4923  ;;  %v498_v44 = vmul.f32 %v3817_v24, %v483_v41  ;;  %v4858_v38 = vld [vmem:[%s5346_s22 + $0xd8] sm:$0xff]   ;;  %v4861_v41 = vld [vmem:[%s5346_s22 + $0x88] sm:$0xff]  }
 0x152   : > { %v4926_v45 = vpop.eup %4925  ;;  %v512_v13 = vadd.f32 %v3818_v31, %v497_v19  ;;  %v484_v47 = vmul.f32 %v4924_v43, %v5286_v28  ;;  %4247 = vmatprep.mubr.bf16.mxu0 %v5365_v42  ;;  %4271 = vmatprep.mubr.bf16.mxu1 %v5365_v42  ;;  %v4862_v19 = vld [vmem:[%s5346_s22 + $0xc8] sm:$0xff]   ;;  %v4863_v43 = vld [vmem:[%s5346_s22 + $0x80] sm:$0xff]  }
 0x153   : > { %v485_v48 = vmul.f32 %v4926_v45, %v5297_v35  ;;  %v513_v52 = vadd.f32 %v3818_v31, %v498_v44  ;;  %v4864_v44 = vld [vmem:[%s5346_s22 + $0xc0] sm:$0xff]   ;;  %v4865_v45 = vld [vmem:[%s5352_s18 + $0x38] sm:$0xff]  }
 0x154   : > { %v5372_v49 = vpack.c.bf16 %v512_v13, %v511_v46  ;;  %v499_v27 = vmul.f32 %v3817_v24, %v484_v47  ;;  %v4866_v46 = vld [vmem:[%s5352_s18 + $0x78] sm:$0xff]   ;;  %v4867_v13 = vld [vmem:[%s5352_s18 + $0x30] sm:$0xff]  }
 0x155   : > { %v4928_v51 = vpop.eup %4927  ;;  %v500_v54 = vmul.f32 %v3817_v24, %v485_v48  ;;  %v4868_v47 = vld [vmem:[%s5352_s18 + $0x70] sm:$0xff]   ;;  %v4869_v48 = vld [vmem:[%s5352_s18 + $0x28] sm:$0xff]  }
 0x156   : > { %v514_v53 = vadd.f32 %v3818_v31, %v499_v27  ;;  %v486_v55 = vmul.f32 %v4928_v51, %v5299_v36  ;;  %4248 = vmatmul.mubr.bf16.vlgmr.msra.gmra.mxu0 %v5372_v49  ;;  %4272 = vmatmul.mubr.bf16.vlgmr.msra.gmra.mxu1 %v5372_v49  ;;  %v4871_v27 = vld [vmem:[%s5352_s18 + $0x20] sm:$0xff]   ;;  %v4873_v51 = vld [vmem:[%s5352_s18 + $0x18] sm:$0xff]  }
 0x157   : > { %4280 = vmatpush3.bf16.msra.mxu0 %v5335_v56  ;;  %4304 = vmatpush3.bf16.msra.mxu1 %v5338_v57  ;;  %v515_v60 = vadd.f32 %v3818_v31, %v500_v54  ;;  %v4823_v56 = vld [vmem:[%s5307_s16 + $0xa0] sm:$0xff]   ;;  %v4876_v54 = vld [vmem:[%s5352_s18 + $0x50] sm:$0xff]  }
 0x158   : > { %v5380_v28 = vpack.c.bf16 %v514_v53, %v513_v52  ;;  %v501_v35 = vmul.f32 %v3817_v24, %v486_v55  ;;  %4281 = vmatprep.subr.bf16.mxu0 %v4819_v20  ;;  %4305 = vmatprep.subr.bf16.mxu1 %v4820_v50  ;;  %v4824_v57 = vld [vmem:[%s5307_s16 + $0xe0] sm:$0xff]   ;;  %v4874_v52 = vld [vmem:[%s5352_s18 + $0x58] sm:$0xff]   ;;  %v4875_v53 = vld [vmem:[%s5352_s18 + $0x10] sm:$0xff]   ;;  %s3989_s16 = sshll.u32 %s6202_s23, 5  ;;  %s6087_s23 = scalar_lea.vmem [#allocation2], %s5328_s19 }
 0x159   : > { %v4847_v24 = vld [vmem:[%s5346_s22] sm:$0xff]   ;;  %v4877_v55 = vld [vmem:[%s5352_s18 + $0x8] sm:$0xff]   ;;  %s5986_s15 = scalar_lea.vmem %s6182_s6, %s3989_s16 }
 0x15a   : > { %v516_v61 = vadd.f32 %v3818_v31, %v501_v35  ;;  %4251 = vmatprep.mubr.bf16.mxu0 %v5380_v28  ;;  %4275 = vmatprep.mubr.bf16.mxu1 %v5380_v28  ;;  %v4852_v31 = vld [vmem:[%s5346_s22 + $0xf0] sm:$0xff]   ;;  %v4878_v35 = vld [vmem:[%s5352_s18 + $0x48] sm:$0xff]  }
 0x15b   : > { %4282 = vmatpush3.bf16.msra.mxu0 %v4819_v20  ;;  %4306 = vmatpush3.bf16.msra.mxu1 %v4820_v50  ;;  %v4870_v20 = vld [vmem:[%s5352_s18 + $0x68] sm:$0xff]   ;;  %v4872_v50 = vld [vmem:[%s5352_s18 + $0x60] sm:$0xff]  }
 0x15c   : > { %v5386_v36 = vpack.c.bf16 %v516_v61, %v515_v60  ;;  %4283 = vmatprep.subr.bf16.mxu0 %v4821_v58  ;;  %4307 = vmatprep.subr.bf16.mxu1 %v4822_v59  ;;  %v4881_v60 = vld [vmem:[%s5352_s18 + $0xb8] sm:$0xff]  }
 0x15d   : > { %v4882_v61 = vld [vmem:[%s5352_s18 + $0xf8] sm:$0xff]  }
 0x15e   : > { %4252 = vmatmul.mubr.bf16.gmra.mxu0 %v5386_v36  ;;  %4276 = vmatmul.mubr.bf16.gmra.mxu1 %v5386_v36 }
 0x15f   : > { %4284 = vmatpush3.bf16.msra.mxu0 %v4821_v58  ;;  %4308 = vmatpush3.bf16.msra.mxu1 %v4822_v59  ;;  %v4879_v58 = vld [vmem:[%s5352_s18] sm:$0xff]  }
 0x160   : > { %4295 = vmatprep.mubr.bf16.mxu0 %v5365_v42  ;;  %4319 = vmatprep.mubr.bf16.mxu1 %v5365_v42  ;;  %v4880_v59 = vld [vmem:[%s5352_s18 + $0x40] sm:$0xff]  }
 0x161   : > { %4285 = vmatprep.subr.bf16.mxu0 %v4823_v56  ;;  %4309 = vmatprep.subr.bf16.mxu1 %v4824_v57 }
 0x163   : > { %4286 = vmatpush3.bf16.msra.mxu0 %v4823_v56  ;;  %4310 = vmatpush3.bf16.msra.mxu1 %v4824_v57  ;;  %v4883_v56 = vld [vmem:[%s5352_s18 + $0xb0] sm:$0xff]  }
 0x164   : > { %4287 = vmatprep.subr.bf16.mxu0 %v4825_v62  ;;  %4311 = vmatprep.subr.bf16.mxu1 %v4826_v63  ;;  %v4884_v57 = vld [vmem:[%s5352_s18 + $0xf0] sm:$0xff]  }
 0x167   : > { %4288 = vmatpush3.bf16.msra.mxu0 %v4825_v62  ;;  %4312 = vmatpush3.bf16.msra.mxu1 %v4826_v63  ;;  %v4885_v62 = vld [vmem:[%s5352_s18 + $0xa8] sm:$0xff]  }
 0x168   : > { %4289 = vmatprep.subr.bf16.mxu0 %v4827_v0  ;;  %4313 = vmatprep.subr.bf16.mxu1 %v4828_v1  ;;  %v4886_v63 = vld [vmem:[%s5352_s18 + $0xe8] sm:$0xff]  }
 0x16b   : > { %4290 = vmatpush3.bf16.msra.mxu0 %v4827_v0  ;;  %4314 = vmatpush3.bf16.msra.mxu1 %v4828_v1  ;;  %v4887_v0 = vld [vmem:[%s5352_s18 + $0xa0] sm:$0xff]  }
 0x16c   : > { %4291 = vmatprep.subr.bf16.mxu0 %v4829_v2  ;;  %4315 = vmatprep.subr.bf16.mxu1 %v4830_v3  ;;  %v4888_v1 = vld [vmem:[%s5352_s18 + $0xe0] sm:$0xff]  }
 0x16f   : > { %4292 = vmatpush3.bf16.msra.mxu0 %v4829_v2  ;;  %4316 = vmatpush3.bf16.msra.mxu1 %v4830_v3  ;;  %v4889_v2 = vld [vmem:[%s5352_s18 + $0x98] sm:$0xff]  }
 0x170   : > { %4293 = vmatprep.subr.bf16.mxu0 %v4831_v4  ;;  %4317 = vmatprep.subr.bf16.mxu1 %v4832_v5  ;;  %v4890_v3 = vld [vmem:[%s5352_s18 + $0xd8] sm:$0xff]  }
 0x173   : > { %4294 = vmatpush3.bf16.msra.mxu0 %v4831_v4  ;;  %4318 = vmatpush3.bf16.msra.mxu1 %v4832_v5  ;;  %v4891_v4 = vld [vmem:[%s5352_s18 + $0x90] sm:$0xff]  }
 0x174   : > { %4327 = vmatprep.subr.bf16.mxu0 %v4833_v6  ;;  %4351 = vmatprep.subr.bf16.mxu1 %v4834_v7  ;;  %v4892_v5 = vld [vmem:[%s5352_s18 + $0xd0] sm:$0xff]  }
 0x176   : > { %4296 = vmatmul.mubr.bf16.vlgmr.msra.gmra.mxu0 %v5372_v49  ;;  %4320 = vmatmul.mubr.bf16.vlgmr.msra.gmra.mxu1 %v5372_v49 }
 0x177   : > { %4299 = vmatprep.mubr.bf16.mxu0 %v5380_v28  ;;  %4323 = vmatprep.mubr.bf16.mxu1 %v5380_v28 }
 0x178   : > { %4328 = vmatpush3.bf16.msra.mxu0 %v4833_v6  ;;  %4352 = vmatpush3.bf16.msra.mxu1 %v4834_v7  ;;  %v4894_v6 = vld [vmem:[%s5352_s18 + $0xc8] sm:$0xff]   ;;  %v4895_v7 = vld [vmem:[%s5352_s18 + $0x80] sm:$0xff]  }
 0x179   : > { %4329 = vmatprep.subr.bf16.mxu0 %v4835_v8  ;;  %4353 = vmatprep.subr.bf16.mxu1 %v4836_v9 }
 0x17c   : > { %4330 = vmatpush3.bf16.msra.mxu0 %v4835_v8  ;;  %4354 = vmatpush3.bf16.msra.mxu1 %v4836_v9  ;;  %v4896_v8 = vld [vmem:[%s5352_s18 + $0xc0] sm:$0xff]  }
 0x17d   : > { %4331 = vmatprep.subr.bf16.mxu0 %v4837_v10  ;;  %4355 = vmatprep.subr.bf16.mxu1 %v4838_v11 }
 0x17e   : > { %4300 = vmatmul.mubr.bf16.gmra.mxu0 %v5386_v36  ;;  %4324 = vmatmul.mubr.bf16.gmra.mxu1 %v5386_v36 }
 0x17f   : > { %4343 = vmatprep.mubr.bf16.mxu0 %v5365_v42  ;;  %4367 = vmatprep.mubr.bf16.mxu1 %v5365_v42 }
 0x180   : > { %4332 = vmatpush3.bf16.msra.mxu0 %v4837_v10  ;;  %4356 = vmatpush3.bf16.msra.mxu1 %v4838_v11 }
 0x181   : > { %4333 = vmatprep.subr.bf16.mxu0 %v4839_v14  ;;  %4357 = vmatprep.subr.bf16.mxu1 %v4840_v15 }
 0x184   : > { %4334 = vmatpush3.bf16.msra.mxu0 %v4839_v14  ;;  %4358 = vmatpush3.bf16.msra.mxu1 %v4840_v15 }
 0x185   : > { %4335 = vmatprep.subr.bf16.mxu0 %v4841_v16  ;;  %4359 = vmatprep.subr.bf16.mxu1 %v4842_v17 }
 0x188   : > { %4336 = vmatpush3.bf16.msra.mxu0 %v4841_v16  ;;  %4360 = vmatpush3.bf16.msra.mxu1 %v4842_v17 }
 0x189   : > { %4337 = vmatprep.subr.bf16.mxu0 %v4843_v18  ;;  %4361 = vmatprep.subr.bf16.mxu1 %v4844_v21 }
 0x18c   : > { %4338 = vmatpush3.bf16.msra.mxu0 %v4843_v18  ;;  %4362 = vmatpush3.bf16.msra.mxu1 %v4844_v21 }
 0x18d   : > { %4339 = vmatprep.subr.bf16.mxu0 %v4845_v22  ;;  %4363 = vmatprep.subr.bf16.mxu1 %v4846_v23 }
 0x190   : > { %4340 = vmatpush3.bf16.msra.mxu0 %v4845_v22  ;;  %4364 = vmatpush3.bf16.msra.mxu1 %v4846_v23 }
 0x191   : > { %4341 = vmatprep.subr.bf16.mxu0 %v4847_v24  ;;  %4365 = vmatprep.subr.bf16.mxu1 %v4848_v25 }
 0x194   : > { %4342 = vmatpush3.bf16.msra.mxu0 %v4847_v24  ;;  %4366 = vmatpush3.bf16.msra.mxu1 %v4848_v25 }
 0x195   : > { %4375 = vmatprep.subr.bf16.mxu0 %v4849_v26  ;;  %4399 = vmatprep.subr.bf16.mxu1 %v4850_v29 }
 0x197   : > { %4344 = vmatmul.mubr.bf16.vlgmr.msra.gmra.mxu0 %v5372_v49  ;;  %4368 = vmatmul.mubr.bf16.vlgmr.msra.gmra.mxu1 %v5372_v49 }
 0x198   : > { %4347 = vmatprep.mubr.bf16.mxu0 %v5380_v28  ;;  %4371 = vmatprep.mubr.bf16.mxu1 %v5380_v28 }
 0x199   : > { %4376 = vmatpush3.bf16.msra.mxu0 %v4849_v26  ;;  %4400 = vmatpush3.bf16.msra.mxu1 %v4850_v29 }
 0x19a   : > { %4377 = vmatprep.subr.bf16.mxu0 %v4851_v30  ;;  %4401 = vmatprep.subr.bf16.mxu1 %v4852_v31 }
 0x19d   : > { %4378 = vmatpush3.bf16.msra.mxu0 %v4851_v30  ;;  %4402 = vmatpush3.bf16.msra.mxu1 %v4852_v31 }
 0x19e   : > { %4379 = vmatprep.subr.bf16.mxu0 %v4853_v32  ;;  %4403 = vmatprep.subr.bf16.mxu1 %v4854_v33 }
 0x19f   : > { %4348 = vmatmul.mubr.bf16.gmra.mxu0 %v5386_v36  ;;  %4372 = vmatmul.mubr.bf16.gmra.mxu1 %v5386_v36 }
 0x1a0   : > { %4391 = vmatprep.mubr.bf16.mxu0 %v5365_v42  ;;  %4415 = vmatprep.mubr.bf16.mxu1 %v5365_v42 }
 0x1a1   : > { %4380 = vmatpush3.bf16.msra.mxu0 %v4853_v32  ;;  %4404 = vmatpush3.bf16.msra.mxu1 %v4854_v33 }
 0x1a2   : > { %4381 = vmatprep.subr.bf16.mxu0 %v4855_v34  ;;  %4405 = vmatprep.subr.bf16.mxu1 %v4856_v12 }
 0x1a5   : > { %4382 = vmatpush3.bf16.msra.mxu0 %v4855_v34  ;;  %4406 = vmatpush3.bf16.msra.mxu1 %v4856_v12 }
 0x1a6   : > { %4383 = vmatprep.subr.bf16.mxu0 %v4857_v37  ;;  %4407 = vmatprep.subr.bf16.mxu1 %v4858_v38 }
 0x1a9   : > { %4384 = vmatpush3.bf16.msra.mxu0 %v4857_v37  ;;  %4408 = vmatpush3.bf16.msra.mxu1 %v4858_v38 }
 0x1aa   : > { %4385 = vmatprep.subr.bf16.mxu0 %v4859_v39  ;;  %4409 = vmatprep.subr.bf16.mxu1 %v4860_v40 }
 0x1ad   : > { %4386 = vmatpush3.bf16.msra.mxu0 %v4859_v39  ;;  %4410 = vmatpush3.bf16.msra.mxu1 %v4860_v40 }
 0x1ae   : > { %4387 = vmatprep.subr.bf16.mxu0 %v4861_v41  ;;  %4411 = vmatprep.subr.bf16.mxu1 %v4862_v19 }
 0x1b1   : > { %4388 = vmatpush3.bf16.msra.mxu0 %v4861_v41  ;;  %4412 = vmatpush3.bf16.msra.mxu1 %v4862_v19 }
 0x1b2   : > { %4389 = vmatprep.subr.bf16.mxu0 %v4863_v43  ;;  %4413 = vmatprep.subr.bf16.mxu1 %v4864_v44 }
 0x1b5   : > { %4390 = vmatpush3.bf16.msra.mxu0 %v4863_v43  ;;  %4414 = vmatpush3.bf16.msra.mxu1 %v4864_v44 }
 0x1b6   : > { %4423 = vmatprep.subr.bf16.mxu0 %v4865_v45  ;;  %4447 = vmatprep.subr.bf16.mxu1 %v4866_v46 }
 0x1b8   : > { %4392 = vmatmul.mubr.bf16.vlgmr.msra.gmra.mxu0 %v5372_v49  ;;  %4416 = vmatmul.mubr.bf16.vlgmr.msra.gmra.mxu1 %v5372_v49 }
 0x1b9   : > { %4395 = vmatprep.mubr.bf16.mxu0 %v5380_v28  ;;  %4419 = vmatprep.mubr.bf16.mxu1 %v5380_v28 }
 0x1ba   : > { %4424 = vmatpush3.bf16.msra.mxu0 %v4865_v45  ;;  %4448 = vmatpush3.bf16.msra.mxu1 %v4866_v46 }
 0x1bb   : > { %4425 = vmatprep.subr.bf16.mxu0 %v4867_v13  ;;  %4449 = vmatprep.subr.bf16.mxu1 %v4868_v47 }
 0x1be   : > { %4426 = vmatpush3.bf16.msra.mxu0 %v4867_v13  ;;  %4450 = vmatpush3.bf16.msra.mxu1 %v4868_v47 }
 0x1bf   : > { %4427 = vmatprep.subr.bf16.mxu0 %v4869_v48  ;;  %4451 = vmatprep.subr.bf16.mxu1 %v4870_v20 }
 0x1c0   : > { %4396 = vmatmul.mubr.bf16.gmra.mxu0 %v5386_v36  ;;  %4420 = vmatmul.mubr.bf16.gmra.mxu1 %v5386_v36 }
 0x1c1   : > { %4439 = vmatprep.mubr.bf16.mxu0 %v5365_v42  ;;  %4463 = vmatprep.mubr.bf16.mxu1 %v5365_v42 }
 0x1c2   : > { %4428 = vmatpush3.bf16.msra.mxu0 %v4869_v48  ;;  %4452 = vmatpush3.bf16.msra.mxu1 %v4870_v20 }
 0x1c3   : > { %4429 = vmatprep.subr.bf16.mxu0 %v4871_v27  ;;  %4453 = vmatprep.subr.bf16.mxu1 %v4872_v50 }
 0x1c6   : > { %4430 = vmatpush3.bf16.msra.mxu0 %v4871_v27  ;;  %4454 = vmatpush3.bf16.msra.mxu1 %v4872_v50 }
 0x1c7   : > { %4431 = vmatprep.subr.bf16.mxu0 %v4873_v51  ;;  %4455 = vmatprep.subr.bf16.mxu1 %v4874_v52 }
 0x1ca   : > { %4432 = vmatpush3.bf16.msra.mxu0 %v4873_v51  ;;  %4456 = vmatpush3.bf16.msra.mxu1 %v4874_v52 }
 0x1cb   : > { %4433 = vmatprep.subr.bf16.mxu0 %v4875_v53  ;;  %4457 = vmatprep.subr.bf16.mxu1 %v4876_v54 }
 0x1ce   : > { %4434 = vmatpush3.bf16.msra.mxu0 %v4875_v53  ;;  %4458 = vmatpush3.bf16.msra.mxu1 %v4876_v54 }
 0x1cf   : > { %4435 = vmatprep.subr.bf16.mxu0 %v4877_v55  ;;  %4459 = vmatprep.subr.bf16.mxu1 %v4878_v35 }
 0x1d2   : > { %4436 = vmatpush3.bf16.msra.mxu0 %v4877_v55  ;;  %4460 = vmatpush3.bf16.msra.mxu1 %v4878_v35 }
 0x1d3   : > { %4437 = vmatprep.subr.bf16.mxu0 %v4879_v58  ;;  %4461 = vmatprep.subr.bf16.mxu1 %v4880_v59 }
 0x1d6   : > { %4438 = vmatpush3.bf16.msra.mxu0 %v4879_v58  ;;  %4462 = vmatpush3.bf16.msra.mxu1 %v4880_v59 }
 0x1d7   : > { %4471 = vmatprep.subr.bf16.mxu0 %v4881_v60  ;;  %4495 = vmatprep.subr.bf16.mxu1 %v4882_v61 }
 0x1d9   : > { %4440 = vmatmul.mubr.bf16.vlgmr.msra.gmra.mxu0 %v5372_v49  ;;  %4464 = vmatmul.mubr.bf16.vlgmr.msra.gmra.mxu1 %v5372_v49 }
 0x1da   : > { %4443 = vmatprep.mubr.bf16.mxu0 %v5380_v28  ;;  %4467 = vmatprep.mubr.bf16.mxu1 %v5380_v28 }
 0x1db   : > { %4472 = vmatpush3.bf16.msra.mxu0 %v4881_v60  ;;  %4496 = vmatpush3.bf16.msra.mxu1 %v4882_v61 }
 0x1dc   : > { %4473 = vmatprep.subr.bf16.mxu0 %v4883_v56  ;;  %4497 = vmatprep.subr.bf16.mxu1 %v4884_v57 }
 0x1df   : > { %4474 = vmatpush3.bf16.msra.mxu0 %v4883_v56  ;;  %4498 = vmatpush3.bf16.msra.mxu1 %v4884_v57 }
 0x1e0   : > { %4475 = vmatprep.subr.bf16.mxu0 %v4885_v62  ;;  %4499 = vmatprep.subr.bf16.mxu1 %v4886_v63 }
 0x1e1   : > { %4444 = vmatmul.mubr.bf16.gmra.mxu0 %v5386_v36  ;;  %4468 = vmatmul.mubr.bf16.gmra.mxu1 %v5386_v36 }
 0x1e2   : > { %4487 = vmatprep.mubr.bf16.mxu0 %v5365_v42  ;;  %4511 = vmatprep.mubr.bf16.mxu1 %v5365_v42  ;;  %v4893_v42 = vld [vmem:[%s5352_s18 + $0x88] sm:$0xff]  }
 0x1e3   : > { %4476 = vmatpush3.bf16.msra.mxu0 %v4885_v62  ;;  %4500 = vmatpush3.bf16.msra.mxu1 %v4886_v63 }
 0x1e4   : > { %4477 = vmatprep.subr.bf16.mxu0 %v4887_v0  ;;  %4501 = vmatprep.subr.bf16.mxu1 %v4888_v1 }
 0x1e7   : > { %4478 = vmatpush3.bf16.msra.mxu0 %v4887_v0  ;;  %4502 = vmatpush3.bf16.msra.mxu1 %v4888_v1 }
 0x1e8   : > { %4479 = vmatprep.subr.bf16.mxu0 %v4889_v2  ;;  %4503 = vmatprep.subr.bf16.mxu1 %v4890_v3 }
 0x1eb   : > { %4480 = vmatpush3.bf16.msra.mxu0 %v4889_v2  ;;  %4504 = vmatpush3.bf16.msra.mxu1 %v4890_v3 }
 0x1ec   : > { %4481 = vmatprep.subr.bf16.mxu0 %v4891_v4  ;;  %4505 = vmatprep.subr.bf16.mxu1 %v4892_v5 }
 0x1ef   : > { %4482 = vmatpush3.bf16.msra.mxu0 %v4891_v4  ;;  %4506 = vmatpush3.bf16.msra.mxu1 %v4892_v5 }
 0x1f0   : > { %4483 = vmatprep.subr.bf16.mxu0 %v4893_v42  ;;  %4507 = vmatprep.subr.bf16.mxu1 %v4894_v6 }
 0x1f3   : > { %4484 = vmatpush3.bf16.msra.mxu0 %v4893_v42  ;;  %4508 = vmatpush3.bf16.msra.mxu1 %v4894_v6 }
 0x1f4   : > { %4485 = vmatprep.subr.bf16.mxu0 %v4895_v7  ;;  %4509 = vmatprep.subr.bf16.mxu1 %v4896_v8 }
 0x1f7   : > { %4486 = vmatpush3.bf16.msra.mxu0 %v4895_v7  ;;  %4510 = vmatpush3.bf16.msra.mxu1 %v4896_v8 }
 0x1fa   : > { %4488 = vmatmul.mubr.bf16.vlgmr.msra.gmra.mxu0 %v5372_v49  ;;  %4512 = vmatmul.mubr.bf16.vlgmr.msra.gmra.mxu1 %v5372_v49 }
 0x1fb   : > { %4491 = vmatprep.mubr.bf16.mxu0 %v5380_v28  ;;  %4515 = vmatprep.mubr.bf16.mxu1 %v5380_v28 }
 0x202   : > { %4492 = vmatmul.mubr.bf16.gmra.mxu0 %v5386_v36  ;;  %4516 = vmatmul.mubr.bf16.gmra.mxu1 %v5386_v36 }
 0x216   : > { %v5504_v9 = vpop.f32.mrf.mxu0  ;;  %v5506_v10 = vpop.f32.mrf.mxu1 }
 0x218   : > { %v667_v11 = vpop.f32.mrf.mxu0  ;;  %v780_v14 = vpop.f32.mrf.mxu1 }
 0x21a   : > { %v5508_v15 = vpop.f32.mrf.mxu0  ;;  %v5510_v16 = vpop.f32.mrf.mxu1 }
 0x21b   : > { %v2070_v49 = vpack.c.bf16 %v5508_v15, %v5504_v9  ;;  %v2074_v28 = vpack.c.bf16 %v5510_v16, %v5506_v10 }
 0x21c   : > { %v670_v17 = vpop.f32.mrf.mxu0  ;;  %v783_v18 = vpop.f32.mrf.mxu1 }
 0x21d   : > { %v2069_v36 = vpack.c.bf16 %v670_v17, %v667_v11  ;;  %v2073_v21 = vpack.c.bf16 %v783_v18, %v780_v14 }
 0x21e   : > { %v5516_v22 = vpop.f32.mrf.mxu0  ;;  %v5518_v23 = vpop.f32.mrf.mxu1 }
 0x21f   : > { %4527 = vmatprep.mubr.msk.bf16.mxu0 %vm2101_vm0, %v2069_v36  ;;  %4543 = vmatprep.mubr.msk.bf16.mxu1 %vm2101_vm0, %v2073_v21 }
 0x220   : > { %v5522_v24 = vpop.f32.mrf.mxu0  ;;  %v5524_v25 = vpop.f32.mrf.mxu1 }
 0x222   : > { %v5526_v26 = vpop.f32.mrf.mxu0  ;;  %v5528_v29 = vpop.f32.mrf.mxu1 }
 0x223   : > { %v2072_v30 = vpack.c.bf16 %v5526_v26, %v5516_v22  ;;  %v2076_v31 = vpack.c.bf16 %v5528_v29, %v5518_v23 }
 0x224   : > { %v5534_v32 = vpop.f32.mrf.mxu0  ;;  %v5536_v33 = vpop.f32.mrf.mxu1 }
 0x225   : > { %v2071_v34 = vpack.c.bf16 %v5534_v32, %v5522_v24  ;;  %v2075_v12 = vpack.c.bf16 %v5536_v33, %v5524_v25 }
 0x236   : > { %v5542_v37 = vpop.f32.mrf.mxu0  ;;  %v5544_v38 = vpop.f32.mrf.mxu1 }
 0x238   : > { %v5546_v39 = vpop.f32.mrf.mxu0  ;;  %v5548_v40 = vpop.f32.mrf.mxu1 }
 0x23a   : > { %v5550_v41 = vpop.f32.mrf.mxu0  ;;  %v5552_v19 = vpop.f32.mrf.mxu1 }
 0x23b   : > { %v2078_v43 = vpack.c.bf16 %v5550_v41, %v5542_v37  ;;  %v2082_v44 = vpack.c.bf16 %v5552_v19, %v5544_v38 }
 0x23c   : > { %v5558_v45 = vpop.f32.mrf.mxu0  ;;  %v5560_v46 = vpop.f32.mrf.mxu1 }
 0x23d   : > { %v2077_v9 = vpack.c.bf16 %v5558_v45, %v5546_v39  ;;  %v2081_v10 = vpack.c.bf16 %v5560_v46, %v5548_v40 }
 0x23e   : > { %v5562_v13 = vpop.f32.mrf.mxu0  ;;  %v5564_v47 = vpop.f32.mrf.mxu1 }
 0x240   : > { %v5566_v48 = vpop.f32.mrf.mxu0  ;;  %v5568_v20 = vpop.f32.mrf.mxu1 }
 0x242   : > { %v5570_v27 = vpop.f32.mrf.mxu0  ;;  %v5572_v50 = vpop.f32.mrf.mxu1 }
 0x243   : > { %v2080_v51 = vpack.c.bf16 %v5570_v27, %v5562_v13  ;;  %v2084_v52 = vpack.c.bf16 %v5572_v50, %v5564_v47 }
 0x244   : > { %v5578_v53 = vpop.f32.mrf.mxu0  ;;  %v5580_v54 = vpop.f32.mrf.mxu1 }
 0x245   : > { %v2079_v55 = vpack.c.bf16 %v5578_v53, %v5566_v48  ;;  %v2083_v35 = vpack.c.bf16 %v5580_v54, %v5568_v20 }
 0x257   : > { %v4345_v58 = vpop.f32.mrf.mxu0  ;;  %v4369_v59 = vpop.f32.mrf.mxu1 }
 0x259   : > { %v1183_v60 = vpop.f32.mrf.mxu0  ;;  %v1296_v61 = vpop.f32.mrf.mxu1 }
 0x25b   : > { %v4346_v56 = vpop.f32.mrf.mxu0  ;;  %v4370_v57 = vpop.f32.mrf.mxu1 }
 0x25c   : > { %v2086_v36 = vpack.c.bf16 %v4346_v56, %v4345_v58  ;;  %v2090_v21 = vpack.c.bf16 %v4370_v57, %v4369_v59 }
 0x25d   : > { %v1186_v62 = vpop.f32.mrf.mxu0  ;;  %v1299_v63 = vpop.f32.mrf.mxu1 }
 0x25f   : > { %v4349_v0 = vpop.f32.mrf.mxu0  ;;  %v4373_v1 = vpop.f32.mrf.mxu1 }
 0x261   : > { %v1199_v2 = vpop.f32.mrf.mxu0  ;;  %v1312_v3 = vpop.f32.mrf.mxu1 }
 0x263   : > { %v4350_v4 = vpop.f32.mrf.mxu0  ;;  %v4374_v5 = vpop.f32.mrf.mxu1 }
 0x264   : > { %v2088_v42 = vpack.c.bf16 %v4350_v4, %v4349_v0  ;;  %v2092_v6 = vpack.c.bf16 %v4374_v5, %v4373_v1  ;;  %v2085_v4 = vpack.c.bf16 %v1186_v62, %v1183_v60  ;;  %v2089_v5 = vpack.c.bf16 %v1299_v63, %v1296_v61 }
 0x265   : > { %v1202_v7 = vpop.f32.mrf.mxu0  ;;  %v1315_v8 = vpop.f32.mrf.mxu1 }
 0x266   : > { %v2124_v11 = vsel %vm2101_vm0, %v2088_v42, 0  ;;  %v2213_v14 = vsel %vm2101_vm0, %v2092_v6, 0  ;;  %v2087_v17 = vpack.c.bf16 %v1202_v7, %v1199_v2  ;;  %v2091_v18 = vpack.c.bf16 %v1315_v8, %v1312_v3  ;;  %4711 = vmatprep.subr.msk.bf16.mxu0 %vm2101_vm0, %v2088_v42  ;;  %4715 = vmatprep.subr.msk.bf16.mxu1 %vm2101_vm0, %v2092_v6 }
 0x267   : > { %4520 = vmatpush3.bf16.xpose.msra.mxu0 %v2124_v11  ;;  %4536 = vmatpush3.bf16.xpose.msra.mxu1 %v2213_v14  ;;  %v2118_v2 = vsel %vm2101_vm0, %v2086_v36, 0  ;;  %v2207_v3 = vsel %vm2101_vm0, %v2090_v21, 0  ;;  %v2115_v7 = vsel %vm2101_vm0, %v2085_v4, 0  ;;  %v2204_v8 = vsel %vm2101_vm0, %v2089_v5, 0 }
 0x268   : > { %4712 = vmatprep.subr.msk.bf16.mxu0 %vm2101_vm0, %v2087_v17  ;;  %4716 = vmatprep.subr.msk.bf16.mxu1 %vm2101_vm0, %v2091_v18  ;;  %v2121_v0 = vsel %vm2101_vm0, %v2087_v17, 0  ;;  %v2210_v1 = vsel %vm2101_vm0, %v2091_v18, 0 }
 0x26f   : > { %4522 = vmatpush3.bf16.xpose.msra.mxu0 %v2121_v0  ;;  %4538 = vmatpush3.bf16.xpose.msra.mxu1 %v2210_v1 }
 0x270   : > { %4713 = vmatprep.subr.msk.bf16.mxu0 %vm2101_vm0, %v2086_v36  ;;  %4717 = vmatprep.subr.msk.bf16.mxu1 %vm2101_vm0, %v2090_v21 }
 0x277   : > { %4524 = vmatpush3.bf16.xpose.msra.mxu0 %v2118_v2  ;;  %4540 = vmatpush3.bf16.xpose.msra.mxu1 %v2207_v3 }
 0x278   : > { %v4393_v58 = vpop.f32.mrf.mxu0  ;;  %v4417_v59 = vpop.f32.mrf.mxu1  ;;  %4714 = vmatprep.subr.msk.bf16.mxu0 %vm2101_vm0, %v2085_v4  ;;  %4718 = vmatprep.subr.msk.bf16.mxu1 %vm2101_vm0, %v2089_v5 }
 0x27a   : > { %v1409_v56 = vpop.f32.mrf.mxu0  ;;  %v1522_v57 = vpop.f32.mrf.mxu1 }
 0x27c   : > { %v4394_v42 = vpop.f32.mrf.mxu0  ;;  %v4418_v6 = vpop.f32.mrf.mxu1 }
 0x27d   : > { %v2094_v15 = vpack.c.bf16 %v4394_v42, %v4393_v58  ;;  %v2098_v16 = vpack.c.bf16 %v4418_v6, %v4417_v59 }
 0x27e   : > { %v1412_v11 = vpop.f32.mrf.mxu0  ;;  %v1525_v14 = vpop.f32.mrf.mxu1 }
 0x27f   : > { %4526 = vmatpush3.bf16.xpose.msra.mxu0 %v2115_v7  ;;  %4542 = vmatpush3.bf16.xpose.msra.mxu1 %v2204_v8  ;;  %v2296_v22 = vsel %vm2101_vm0, %v2094_v15, 0  ;;  %v2385_v23 = vsel %vm2101_vm0, %v2098_v16, 0  ;;  %v2093_v24 = vpack.c.bf16 %v1412_v11, %v1409_v56  ;;  %v2097_v25 = vpack.c.bf16 %v1525_v14, %v1522_v57 }
 0x280   : > { %v4397_v60 = vpop.f32.mrf.mxu0  ;;  %v4421_v61 = vpop.f32.mrf.mxu1 }
 0x281   : > { %v2293_v39 = vsel %vm2101_vm0, %v2093_v24, 0  ;;  %v2382_v40 = vsel %vm2101_vm0, %v2097_v25, 0 }
 0x282   : > { %v1425_v62 = vpop.f32.mrf.mxu0  ;;  %v1538_v63 = vpop.f32.mrf.mxu1 }
 0x284   : > { %v4398_v17 = vpop.f32.mrf.mxu0  ;;  %v4422_v18 = vpop.f32.mrf.mxu1 }
 0x285   : > { %v2096_v36 = vpack.c.bf16 %v4398_v17, %v4397_v60  ;;  %v2100_v21 = vpack.c.bf16 %v4422_v18, %v4421_v61 }
 0x286   : > { %v1428_v0 = vpop.f32.mrf.mxu0  ;;  %v1541_v1 = vpop.f32.mrf.mxu1  ;;  %4528 = vmatmul.mubr.msk.bf16.vlgmr.msra.gmra.mxu0 %vm2101_vm0, %v2070_v49  ;;  %4544 = vmatmul.mubr.msk.bf16.vlgmr.msra.gmra.mxu1 %vm2101_vm0, %v2074_v28 }
 0x287   : > { %v2302_v2 = vsel %vm2101_vm0, %v2096_v36, 0  ;;  %v2391_v3 = vsel %vm2101_vm0, %v2100_v21, 0  ;;  %v2095_v4 = vpack.c.bf16 %v1428_v0, %v1425_v62  ;;  %v2099_v5 = vpack.c.bf16 %v1541_v1, %v1538_v63  ;;  %4719 = vmatprep.subr.msk.bf16.mxu0 %vm2101_vm0, %v2096_v36  ;;  %4723 = vmatprep.subr.msk.bf16.mxu1 %vm2101_vm0, %v2100_v21 }
 0x288   : > { %4531 = vmatprep.mubr.msk.bf16.mxu0 %vm2101_vm0, %v2071_v34  ;;  %4547 = vmatprep.mubr.msk.bf16.mxu1 %vm2101_vm0, %v2075_v12 }
 0x289   : > { %4552 = vmatpush3.bf16.xpose.msra.mxu0 %v2302_v2  ;;  %4568 = vmatpush3.bf16.xpose.msra.mxu1 %v2391_v3  ;;  %v2299_v49 = vsel %vm2101_vm0, %v2095_v4, 0  ;;  %v2388_v28 = vsel %vm2101_vm0, %v2099_v5, 0 }
 0x28a   : > { %4720 = vmatprep.subr.msk.bf16.mxu0 %vm2101_vm0, %v2095_v4  ;;  %4724 = vmatprep.subr.msk.bf16.mxu1 %vm2101_vm0, %v2099_v5 }
 0x28e   : > { %4532 = vmatmul.mubr.msk.bf16.gmra.mxu0 %vm2101_vm0, %v2072_v30  ;;  %4548 = vmatmul.mubr.msk.bf16.gmra.mxu1 %vm2101_vm0, %v2076_v31 }
 0x28f   : > { %4559 = vmatprep.mubr.msk.bf16.mxu0 %vm2101_vm0, %v2077_v9  ;;  %4575 = vmatprep.mubr.msk.bf16.mxu1 %vm2101_vm0, %v2081_v10 }
 0x291   : > { %4554 = vmatpush3.bf16.xpose.msra.mxu0 %v2299_v49  ;;  %4570 = vmatpush3.bf16.xpose.msra.mxu1 %v2388_v28 }
 0x292   : > { %4721 = vmatprep.subr.msk.bf16.mxu0 %vm2101_vm0, %v2094_v15  ;;  %4725 = vmatprep.subr.msk.bf16.mxu1 %vm2101_vm0, %v2098_v16 }
 0x299   : > { %v4441_v26 = vpop.f32.mrf.mxu0  ;;  %v4465_v29 = vpop.f32.mrf.mxu1  ;;  %4556 = vmatpush3.bf16.xpose.msra.mxu0 %v2296_v22  ;;  %4572 = vmatpush3.bf16.xpose.msra.mxu1 %v2385_v23 }
 0x29a   : > { %4722 = vmatprep.subr.msk.bf16.mxu0 %vm2101_vm0, %v2093_v24  ;;  %4726 = vmatprep.subr.msk.bf16.mxu1 %vm2101_vm0, %v2097_v25 }
 0x29b   : > { %v1699_v30 = vpop.f32.mrf.mxu0  ;;  %v1812_v31 = vpop.f32.mrf.mxu1 }
 0x29d   : > { %v4442_v32 = vpop.f32.mrf.mxu0  ;;  %v4466_v33 = vpop.f32.mrf.mxu1 }
 0x29e   : > { %v2827_v37 = vpack.c.bf16 %v4442_v32, %v4441_v26  ;;  %v2831_v38 = vpack.c.bf16 %v4466_v33, %v4465_v29 }
 0x29f   : > { %v1702_v34 = vpop.f32.mrf.mxu0  ;;  %v1815_v12 = vpop.f32.mrf.mxu1 }
 0x2a0   : > { %v2826_v41 = vpack.c.bf16 %v1702_v34, %v1699_v30  ;;  %v2830_v19 = vpack.c.bf16 %v1815_v12, %v1812_v31 }
 0x2a1   : > { %v4445_v45 = vpop.f32.mrf.mxu0  ;;  %v4469_v46 = vpop.f32.mrf.mxu1  ;;  %4558 = vmatpush3.bf16.xpose.msra.mxu0 %v2293_v39  ;;  %4574 = vmatpush3.bf16.xpose.msra.mxu1 %v2382_v40 }
 0x2a3   : > { %v1715_v58 = vpop.f32.mrf.mxu0  ;;  %v1828_v59 = vpop.f32.mrf.mxu1 }
 0x2a5   : > { %v4446_v56 = vpop.f32.mrf.mxu0  ;;  %v4470_v57 = vpop.f32.mrf.mxu1 }
 0x2a6   : > { %v2829_v42 = vpack.c.bf16 %v4446_v56, %v4445_v45  ;;  %v2833_v6 = vpack.c.bf16 %v4470_v57, %v4469_v46 }
 0x2a7   : > { %v1718_v7 = vpop.f32.mrf.mxu0  ;;  %v1831_v8 = vpop.f32.mrf.mxu1 }
 0x2a8   : > { %v2828_v11 = vpack.c.bf16 %v1718_v7, %v1715_v58  ;;  %v2832_v14 = vpack.c.bf16 %v1831_v8, %v1828_v59  ;;  %4560 = vmatmul.mubr.msk.bf16.vlgmr.msra.gmra.mxu0 %vm2101_vm0, %v2078_v43  ;;  %4576 = vmatmul.mubr.msk.bf16.vlgmr.msra.gmra.mxu1 %vm2101_vm0, %v2082_v44 }
 0x2a9   : > { %4583 = vmatprep.subr.bf16.mxu0 %v2829_v42  ;;  %4599 = vmatprep.subr.bf16.mxu1 %v2833_v6 }
 0x2aa   : > { %4563 = vmatprep.mubr.msk.bf16.mxu0 %vm2101_vm0, %v2079_v55  ;;  %4579 = vmatprep.mubr.msk.bf16.mxu1 %vm2101_vm0, %v2083_v35 }
 0x2ab   : > { %4584 = vmatpush3.bf16.msra.mxu0 %v2829_v42  ;;  %4600 = vmatpush3.bf16.msra.mxu1 %v2833_v6 }
 0x2ac   : > { %4585 = vmatprep.subr.bf16.mxu0 %v2828_v11  ;;  %4601 = vmatprep.subr.bf16.mxu1 %v2832_v14 }
 0x2af   : > { %4586 = vmatpush3.bf16.msra.mxu0 %v2828_v11  ;;  %4602 = vmatpush3.bf16.msra.mxu1 %v2832_v14 }
 0x2b0   : > { %4587 = vmatprep.subr.bf16.mxu0 %v2827_v37  ;;  %4603 = vmatprep.subr.bf16.mxu1 %v2831_v38 }
 0x2b1   : > { %4564 = vmatmul.mubr.msk.bf16.gmra.mxu0 %vm2101_vm0, %v2080_v51  ;;  %4580 = vmatmul.mubr.msk.bf16.gmra.mxu1 %vm2101_vm0, %v2084_v52 }
 0x2b3   : > { %4588 = vmatpush3.bf16.msra.mxu0 %v2827_v37  ;;  %4604 = vmatpush3.bf16.msra.mxu1 %v2831_v38 }
 0x2b4   : > { %4589 = vmatprep.subr.bf16.mxu0 %v2826_v41  ;;  %4605 = vmatprep.subr.bf16.mxu1 %v2830_v19 }
 0x2b7   : > { %4590 = vmatpush3.bf16.msra.mxu0 %v2826_v41  ;;  %4606 = vmatpush3.bf16.msra.mxu1 %v2830_v19 }
 0x2ba   : > { %v4489_v43 = vpop.f32.mrf.mxu0  ;;  %v4513_v44 = vpop.f32.mrf.mxu1 }
 0x2bc   : > { %v1925_v48 = vpop.f32.mrf.mxu0  ;;  %v2038_v20 = vpop.f32.mrf.mxu1 }
 0x2be   : > { %v4490_v13 = vpop.f32.mrf.mxu0  ;;  %v4514_v27 = vpop.f32.mrf.mxu1 }
 0x2bf   : > { %v5672_v51 = vpack.c.bf16 %v4490_v13, %v4489_v43  ;;  %v5674_v53 = vpack.c.bf16 %v4514_v27, %v4513_v44 }
 0x2c0   : > { %v1928_v47 = vpop.f32.mrf.mxu0  ;;  %v2041_v50 = vpop.f32.mrf.mxu1 }
 0x2c1   : > { %v5676_v52 = vpack.c.bf16 %v1928_v47, %v1925_v48  ;;  %v5678_v54 = vpack.c.bf16 %v2041_v50, %v2038_v20 }
 0x2c2   : > { %v4493_v55 = vpop.f32.mrf.mxu0  ;;  %v4517_v35 = vpop.f32.mrf.mxu1 }
 0x2c4   : > { %v5680_v60 = vpop.f32.mrf.mxu0  ;;  %v5682_v61 = vpop.f32.mrf.mxu1 }
 0x2c6   : > { %v4494_v62 = vpop.f32.mrf.mxu0  ;;  %v4518_v63 = vpop.f32.mrf.mxu1 }
 0x2c7   : > { %v5684_v17 = vpack.c.bf16 %v4494_v62, %v4493_v55  ;;  %v5686_v18 = vpack.c.bf16 %v4518_v63, %v4517_v35 }
 0x2c8   : > { %v5690_v36 = vpop.f32.mrf.mxu0  ;;  %v5692_v21 = vpop.f32.mrf.mxu1 }
 0x2c9   : > { %4615 = vmatprep.subr.bf16.mxu0 %v5684_v17  ;;  %4631 = vmatprep.subr.bf16.mxu1 %v5686_v18 }
 0x346   : > { %v5694_v0 = vpop.f32.mrf.mxu0  ;;  %v5696_v1 = vpop.f32.mrf.mxu1 }
 0x347   : > { %v2464_v2 = vsel %vm2101_vm0, %v5694_v0, -inf  ;;  %v2488_v9 = vsel %vm2101_vm0, %v5696_v1, -inf }
 0x348   : > { %v5700_v3 = vpop.f32.mrf.mxu1  ;;  %2465 = vmax.xlane.f32.xlu0 %v2464_v2  ;;  %v5702_v4 = vpop.f32.mrf.mxu0 }
 0x349   : > { %v2458_v49 = vsel %vm2101_vm0, %v5702_v4, -inf  ;;  %v2482_v24 = vsel %vm2101_vm0, %v5700_v3, -inf }
 0x34a   : > { %v5704_v5 = vpop.f32.mrf.mxu0  ;;  %v5710_v15 = vpop.f32.mrf.mxu1 }
 0x34b   : > { %v2467_v10 = vsel %vm2101_vm0, %v5704_v5, -inf  ;;  %v2491_v28 = vsel %vm2101_vm0, %v5710_v15, -inf }
 0x34c   : > { %2489 = vmax.xlane.f32.xlu0 %v2488_v9  ;;  %2468 = vmax.xlane.f32.xlu1 %v2467_v10  ;;  %v5712_v16 = vpop.f32.mrf.mxu0  ;;  %v5718_v22 = vpop.f32.mrf.mxu1 }
 0x34d   : > { %v2461_v25 = vsel %vm2101_vm0, %v5712_v16, -inf  ;;  %v2485_v30 = vsel %vm2101_vm0, %v5718_v22, -inf }
 0x34e   : > { %v5720_v23 = vpop.f32.mrf.mxu0  ;;  %v5726_v26 = vpop.f32.mrf.mxu1 }
 0x34f   : > { %v2476_v31 = vsel %vm2101_vm0, %v5720_v23, -inf  ;;  %v2500_v34 = vsel %vm2101_vm0, %v5726_v26, -inf }
 0x350   : > { %2459 = vmax.xlane.f32.xlu0 %v2458_v49  ;;  %2492 = vmax.xlane.f32.xlu1 %v2491_v28  ;;  %v5728_v29 = vpop.f32.mrf.mxu0  ;;  %v5734_v32 = vpop.f32.mrf.mxu1 }
 0x351   : > { %v2470_v40 = vsel %vm2101_vm0, %v5728_v29, -inf  ;;  %v2494_v58 = vsel %vm2101_vm0, %v5734_v32, -inf }
 0x352   : > { %v5736_v33 = vpop.f32.mrf.mxu0  ;;  %v5742_v39 = vpop.f32.mrf.mxu1 }
 0x353   : > { %v2479_v12 = vsel %vm2101_vm0, %v5736_v33, -inf  ;;  %v2503_v45 = vsel %vm2101_vm0, %v5742_v39, -inf }
 0x354   : > { %2483 = vmax.xlane.f32.xlu0 %v2482_v24  ;;  %2462 = vmax.xlane.f32.xlu1 %v2461_v25  ;;  %v5748_v46 = vpop.f32.mrf.mxu0  ;;  %v5754_v56 = vpop.f32.mrf.mxu1 }
 0x355   : > { %v2473_v59 = vsel %vm2101_vm0, %v5748_v46, -inf  ;;  %v2497_v57 = vsel %vm2101_vm0, %v5754_v56, -inf }
 0x358   : > { %2486 = vmax.xlane.f32.xlu1 %v2485_v30  ;;  %2477 = vmax.xlane.f32.xlu0 %v2476_v31 }
 0x35c   : > { %2501 = vmax.xlane.f32.xlu0 %v2500_v34  ;;  %2480 = vmax.xlane.f32.xlu1 %v2479_v12 }
 0x360   : > { %2471 = vmax.xlane.f32.xlu0 %v2470_v40  ;;  %2504 = vmax.xlane.f32.xlu1 %v2503_v45 }
 0x364   : > { %2495 = vmax.xlane.f32.xlu0 %v2494_v58  ;;  %2474 = vmax.xlane.f32.xlu1 %v2473_v59 }
 0x368   : > { %v5758_v42 = vpop.f32.mrf.mxu0  ;;  %v5760_v6 = vpop.f32.mrf.mxu1  ;;  %2498 = vmax.xlane.f32.xlu1 %v2497_v57 }
 0x369   : > { %v2512_v7 = vsel %vm2101_vm0, %v5758_v42, -inf  ;;  %v2536_v37 = vsel %vm2101_vm0, %v5760_v6, -inf }
 0x36a   : > { %v5764_v8 = vpop.f32.mrf.mxu1  ;;  %2513 = vmax.xlane.f32.xlu0 %v2512_v7  ;;  %v5766_v11 = vpop.f32.mrf.mxu0 }
 0x36b   : > { %v2506_v43 = vsel %vm2101_vm0, %v5766_v11, -inf  ;;  %v2530_v13 = vsel %vm2101_vm0, %v5764_v8, -inf }
 0x36c   : > { %v5768_v14 = vpop.f32.mrf.mxu0  ;;  %v5774_v41 = vpop.f32.mrf.mxu1 }
 0x36d   : > { %v2515_v38 = vsel %vm2101_vm0, %v5768_v14, -inf  ;;  %v2539_v44 = vsel %vm2101_vm0, %v5774_v41, -inf }
 0x36e   : > { %2537 = vmax.xlane.f32.xlu0 %v2536_v37  ;;  %2516 = vmax.xlane.f32.xlu1 %v2515_v38  ;;  %v5776_v19 = vpop.f32.mrf.mxu0  ;;  %v5782_v48 = vpop.f32.mrf.mxu1 }
 0x36f   : > { %v2509_v27 = vsel %vm2101_vm0, %v5776_v19, -inf  ;;  %v2533_v55 = vsel %vm2101_vm0, %v5782_v48, -inf }
 0x371   : > { %v5784_v20 = vpop.f32.mrf.mxu0  ;;  %v5790_v47 = vpop.f32.mrf.mxu1 }
 0x372   : > { %2507 = vmax.xlane.f32.xlu0 %v2506_v43  ;;  %2540 = vmax.xlane.f32.xlu1 %v2539_v44  ;;  %v2524_v35 = vsel %vm2101_vm0, %v5784_v20, -inf  ;;  %v2548_v30 = vsel %vm2101_vm0, %v5790_v47, -inf }
 0x373   : > { %v5792_v50 = vpop.f32.mrf.mxu0  ;;  %v5798_v62 = vpop.f32.mrf.mxu1 }
 0x374   : > { %v2518_v2 = vsel %vm2101_vm0, %v5792_v50, -inf  ;;  %v2542_v28 = vsel %vm2101_vm0, %v5798_v62, -inf }
 0x375   : > { %v5800_v63 = vpop.f32.mrf.mxu0  ;;  %v5806_v10 = vpop.f32.mrf.mxu1 }
 0x376   : > { %2531 = vmax.xlane.f32.xlu0 %v2530_v13  ;;  %2510 = vmax.xlane.f32.xlu1 %v2509_v27  ;;  %v2527_v9 = vsel %vm2101_vm0, %v5800_v63, -inf  ;;  %v2551_v34 = vsel %vm2101_vm0, %v5806_v10, -inf }
 0x377   : > { %v5808_v49 = vpop.f32.mrf.mxu0  ;;  %v5814_v25 = vpop.f32.mrf.mxu1 }
 0x378   : > { %v2521_v24 = vsel %vm2101_vm0, %v5808_v49, -inf  ;;  %v2545_v31 = vsel %vm2101_vm0, %v5814_v25, -inf }
 0x37a   : > { %2534 = vmax.xlane.f32.xlu1 %v2533_v55  ;;  %2525 = vmax.xlane.f32.xlu0 %v2524_v35 }
 0x37e   : > { %2519 = vmax.xlane.f32.xlu0 %v2518_v2  ;;  %2528 = vmax.xlane.f32.xlu1 %v2527_v9 }
 0x382   : > { %2543 = vmax.xlane.f32.xlu0 %v2542_v28  ;;  %2522 = vmax.xlane.f32.xlu1 %v2521_v24 }
 0x386   : > { %2549 = vmax.xlane.f32.xlu0 %v2548_v30  ;;  %2546 = vmax.xlane.f32.xlu1 %v2545_v31 }
 0x38a   : > { %2552 = vmax.xlane.f32.xlu1 %v2551_v34 }
 0x3d1   : > { %v2466_v12 = vpop.xlane.xlu0 %2465 }
 0x3d2   : > { %v2556_v40 = vsub.f32 %v5694_v0, %v2466_v12 }
 0x3d4   : > { %v2590_v45 = vmul.f32 1.442695, %v2556_v40 }
 0x3d5   : > { %v2490_v58 = vpop.xlane.xlu0 %2489  ;;  %v2469_v59 = vpop.xlane.xlu1 %2468 }
 0x3d6   : > { %4929 = vpow2.f32 %v2590_v45  ;;  %v2564_v57 = vsub.f32 %v5696_v1, %v2490_v58  ;;  %v2557_v7 = vsub.f32 %v5704_v5, %v2469_v59 }
 0x3d8   : > { %v2606_v37 = vmul.f32 1.442695, %v2564_v57  ;;  %v2592_v38 = vmul.f32 1.442695, %v2557_v7 }
 0x3d9   : > { %v2460_v43 = vpop.xlane.xlu0 %2459  ;;  %v2493_v44 = vpop.xlane.xlu1 %2492 }
 0x3da   : > { %4931 = vpow2.f32 %v2606_v37  ;;  %v2554_v13 = vsub.f32 %v5702_v4, %v2460_v43  ;;  %v2565_v27 = vsub.f32 %v5710_v15, %v2493_v44 }
 0x3db   : > { %4933 = vpow2.f32 %v2592_v38 }
 0x3dc   : > { %v2586_v55 = vmul.f32 1.442695, %v2554_v13  ;;  %v2608_v0 = vmul.f32 1.442695, %v2565_v27 }
 0x3dd   : > { %v2484_v35 = vpop.xlane.xlu0 %2483  ;;  %v2463_v2 = vpop.xlane.xlu1 %2462 }
 0x3de   : > { %4935 = vpow2.f32 %v2586_v55  ;;  %v2562_v9 = vsub.f32 %v5700_v3, %v2484_v35  ;;  %v2555_v1 = vsub.f32 %v5712_v16, %v2463_v2 }
 0x3df   : > { %4937 = vpow2.f32 %v2608_v0 }
 0x3e0   : > { %v2602_v5 = vmul.f32 1.442695, %v2562_v9  ;;  %v2588_v28 = vmul.f32 1.442695, %v2555_v1 }
 0x3e1   : > { %v2487_v24 = vpop.xlane.xlu1 %2486  ;;  %v2478_v30 = vpop.xlane.xlu0 %2477 }
 0x3e2   : > { %4939 = vpow2.f32 %v2602_v5  ;;  %v2563_v4 = vsub.f32 %v5718_v22, %v2487_v24  ;;  %v2560_v15 = vsub.f32 %v5720_v23, %v2478_v30 }
 0x3e3   : > { %v5831_v31 = vpop.eup %4929  ;;  %4941 = vpow2.f32 %v2588_v28 }
 0x3e4   : > { %v2604_v34 = vmul.f32 1.442695, %v2563_v4  ;;  %v2598_v12 = vmul.f32 1.442695, %v2560_v15  ;;  %v2656_v3 = vsel %vm2101_vm0, %v5831_v31, 0.0 }
 0x3e5   : > { %v2502_v40 = vpop.xlane.xlu0 %2501  ;;  %v2481_v16 = vpop.xlane.xlu1 %2480  ;;  %2657 = vadd.xlane.f32.xlu0 %v2656_v3 }
 0x3e6   : > { %4943 = vpow2.f32 %v2604_v34  ;;  %v2568_v45 = vsub.f32 %v5726_v26, %v2502_v40  ;;  %v2561_v58 = vsub.f32 %v5736_v33, %v2481_v16 }
 0x3e7   : > { %v5837_v59 = vpop.eup %4931  ;;  %4945 = vpow2.f32 %v2598_v12 }
 0x3e8   : > { %v5839_v22 = vpop.eup %4933  ;;  %v2614_v23 = vmul.f32 1.442695, %v2568_v45  ;;  %v2600_v57 = vmul.f32 1.442695, %v2561_v58  ;;  %v2680_v7 = vsel %vm2101_vm0, %v5837_v59, 0.0 }
 0x3e9   : > { %v2472_v37 = vpop.xlane.xlu0 %2471  ;;  %v2505_v38 = vpop.xlane.xlu1 %2504  ;;  %2681 = vadd.xlane.f32.xlu0 %v2680_v7  ;;  %v2659_v43 = vsel %vm2101_vm0, %v5839_v22, 0.0 }
 0x3ea   : > { %4947 = vpow2.f32 %v2614_v23  ;;  %v2558_v26 = vsub.f32 %v5728_v29, %v2472_v37  ;;  %v2569_v33 = vsub.f32 %v5742_v39, %v2505_v38  ;;  %2660 = vadd.xlane.f32.xlu1 %v2659_v43 }
 0x3eb   : > { %v5847_v44 = vpop.eup %4935  ;;  %4949 = vpow2.f32 %v2600_v57 }
 0x3ec   : > { %v5849_v13 = vpop.eup %4937  ;;  %v2594_v27 = vmul.f32 1.442695, %v2558_v26  ;;  %v2616_v55 = vmul.f32 1.442695, %v2569_v33  ;;  %v2650_v0 = vsel %vm2101_vm0, %v5847_v44, 0.0 }
 0x3ed   : > { %v2496_v35 = vpop.xlane.xlu0 %2495  ;;  %v2475_v2 = vpop.xlane.xlu1 %2474  ;;  %2651 = vadd.xlane.f32.xlu0 %v2650_v0  ;;  %v2683_v9 = vsel %vm2101_vm0, %v5849_v13, 0.0 }
 0x3ee   : > { %4951 = vpow2.f32 %v2594_v27  ;;  %v2566_v29 = vsub.f32 %v5734_v32, %v2496_v35  ;;  %v2559_v39 = vsub.f32 %v5748_v46, %v2475_v2  ;;  %2684 = vadd.xlane.f32.xlu1 %v2683_v9 }
 0x3ef   : > { %v5857_v1 = vpop.eup %4939  ;;  %4953 = vpow2.f32 %v2616_v55 }
 0x3f0   : > { %v5859_v5 = vpop.eup %4941  ;;  %v2610_v28 = vmul.f32 1.442695, %v2566_v29  ;;  %v2596_v24 = vmul.f32 1.442695, %v2559_v39  ;;  %v2674_v30 = vsel %vm2101_vm0, %v5857_v1, 0.0 }
 0x3f1   : > { %v2499_v4 = vpop.xlane.xlu1 %2498  ;;  %2675 = vadd.xlane.f32.xlu0 %v2674_v30  ;;  %v2653_v15 = vsel %vm2101_vm0, %v5859_v5, 0.0 }
 0x3f2   : > { %4955 = vpow2.f32 %v2610_v28  ;;  %v2567_v32 = vsub.f32 %v5754_v56, %v2499_v4  ;;  %2654 = vadd.xlane.f32.xlu1 %v2653_v15 }
 0x3f3   : > { %v5866_v46 = vpop.eup %4943  ;;  %4957 = vpow2.f32 %v2596_v24  ;;  %v2514_v34 = vpop.xlane.xlu0 %2513 }
 0x3f4   : > { %v5868_v12 = vpop.eup %4945  ;;  %v2612_v3 = vmul.f32 1.442695, %v2567_v32  ;;  %v2572_v40 = vsub.f32 %v5758_v42, %v2514_v34  ;;  %v2677_v16 = vsel %vm2101_vm0, %v5866_v46, 0.0 }
 0x3f5   : > { %v2668_v45 = vsel %vm2101_vm0, %v5868_v12, 0.0 }
 0x3f6   : > { %4959 = vpow2.f32 %v2612_v3  ;;  %v2622_v58 = vmul.f32 1.442695, %v2572_v40  ;;  %2669 = vadd.xlane.f32.xlu0 %v2668_v45  ;;  %2678 = vadd.xlane.f32.xlu1 %v2677_v16 }
 0x3f7   : > { %v5875_v56 = vpop.eup %4947  ;;  %v2538_v23 = vpop.xlane.xlu0 %2537 }
 0x3f8   : > { %v2517_v57 = vpop.xlane.xlu1 %2516  ;;  %v5877_v7 = vpop.eup %4949  ;;  %4961 = vpow2.f32 %v2622_v58  ;;  %v2580_v37 = vsub.f32 %v5760_v6, %v2538_v23  ;;  %v2692_v38 = vsel %vm2101_vm0, %v5875_v56, 0.0 }
 0x3f9   : > { %v2573_v42 = vsub.f32 %v5768_v14, %v2517_v57  ;;  %v2671_v43 = vsel %vm2101_vm0, %v5877_v7, 0.0 }
 0x3fa   : > { %v2638_v26 = vmul.f32 1.442695, %v2580_v37  ;;  %2693 = vadd.xlane.f32.xlu0 %v2692_v38  ;;  %2672 = vadd.xlane.f32.xlu1 %v2671_v43 }
 0x3fb   : > { %v2624_v33 = vmul.f32 1.442695, %v2573_v42  ;;  %v5885_v27 = vpop.eup %4951  ;;  %v2508_v55 = vpop.xlane.xlu0 %2507 }
 0x3fc   : > { %v2541_v0 = vpop.xlane.xlu1 %2540  ;;  %v5887_v35 = vpop.eup %4953  ;;  %4963 = vpow2.f32 %v2638_v26  ;;  %v2570_v6 = vsub.f32 %v5766_v11, %v2508_v55  ;;  %v2662_v2 = vsel %vm2101_vm0, %v5885_v27, 0.0 }
 0x3fd   : > { %v2581_v14 = vsub.f32 %v5774_v41, %v2541_v0  ;;  %4965 = vpow2.f32 %v2624_v33  ;;  %v2695_v9 = vsel %vm2101_vm0, %v5887_v35, 0.0 }
 0x3fe   : > { %v2618_v29 = vmul.f32 1.442695, %v2570_v6  ;;  %2663 = vadd.xlane.f32.xlu0 %v2662_v2  ;;  %2696 = vadd.xlane.f32.xlu1 %v2695_v9 }
 0x3ff   : > { %v2640_v39 = vmul.f32 1.442695, %v2581_v14  ;;  %v5895_v28 = vpop.eup %4955  ;;  %v2532_v24 = vpop.xlane.xlu0 %2531 }
 0x400   : > { %v2511_v30 = vpop.xlane.xlu1 %2510  ;;  %v5897_v4 = vpop.eup %4957  ;;  %4967 = vpow2.f32 %v2618_v29  ;;  %v2578_v11 = vsub.f32 %v5764_v8, %v2532_v24  ;;  %v2686_v15 = vsel %vm2101_vm0, %v5895_v28, 0.0 }
 0x401   : > { %v2571_v41 = vsub.f32 %v5776_v19, %v2511_v30  ;;  %4969 = vpow2.f32 %v2640_v39  ;;  %v2665_v32 = vsel %vm2101_vm0, %v5897_v4, 0.0 }
 0x402   : > { %v2634_v34 = vmul.f32 1.442695, %v2578_v11  ;;  %2687 = vadd.xlane.f32.xlu0 %v2686_v15  ;;  %2666 = vadd.xlane.f32.xlu1 %v2665_v32 }
 0x403   : > { %v2620_v3 = vmul.f32 1.442695, %v2571_v41  ;;  %v5905_v40 = vpop.eup %4959  ;;  %v2526_v45 = vpop.xlane.xlu0 %2525 }
 0x404   : > { %v2535_v16 = vpop.xlane.xlu1 %2534  ;;  %4971 = vpow2.f32 %v2634_v34  ;;  %v2576_v19 = vsub.f32 %v5784_v20, %v2526_v45  ;;  %v2689_v58 = vsel %vm2101_vm0, %v5905_v40, 0.0 }
 0x405   : > { %v2579_v8 = vsub.f32 %v5782_v48, %v2535_v16  ;;  %v5911_v23 = vpop.eup %4961  ;;  %4973 = vpow2.f32 %v2620_v3 }
 0x406   : > { %v2630_v37 = vmul.f32 1.442695, %v2576_v19  ;;  %v2704_v42 = vsel %vm2101_vm0, %v5911_v23, 0.0  ;;  %2690 = vadd.xlane.f32.xlu1 %v2689_v58 }
 0x407   : > { %v2636_v57 = vmul.f32 1.442695, %v2579_v8  ;;  %2705 = vadd.xlane.f32.xlu0 %v2704_v42  ;;  %v2520_v38 = vpop.xlane.xlu0 %2519 }
 0x408   : > { %v2529_v43 = vpop.xlane.xlu1 %2528  ;;  %v2574_v48 = vsub.f32 %v5792_v50, %v2520_v38 }
 0x409   : > { %4975 = vpow2.f32 %v2636_v57  ;;  %v2577_v20 = vsub.f32 %v5800_v63, %v2529_v43  ;;  %v5917_v26 = vpop.eup %4963 }
 0x40a   : > { %4977 = vpow2.f32 %v2630_v37  ;;  %v5919_v33 = vpop.eup %4965  ;;  %v2626_v55 = vmul.f32 1.442695, %v2574_v48  ;;  %v2728_v6 = vsel %vm2101_vm0, %v5917_v26, 0.0 }
 0x40b   : > { %v2632_v0 = vmul.f32 1.442695, %v2577_v20  ;;  %2729 = vadd.xlane.f32.xlu0 %v2728_v6  ;;  %v2544_v14 = vpop.xlane.xlu0 %2543  ;;  %v2707_v2 = vsel %vm2101_vm0, %v5919_v33, 0.0 }
 0x40c   : > { %v2523_v9 = vpop.xlane.xlu1 %2522  ;;  %4979 = vpow2.f32 %v2626_v55  ;;  %v2582_v50 = vsub.f32 %v5798_v62, %v2544_v14  ;;  %2708 = vadd.xlane.f32.xlu1 %v2707_v2 }
 0x40d   : > { %v2575_v63 = vsub.f32 %v5808_v49, %v2523_v9  ;;  %v5927_v29 = vpop.eup %4967  ;;  %4981 = vpow2.f32 %v2632_v0 }
 0x40e   : > { %v5929_v39 = vpop.eup %4969  ;;  %v2642_v24 = vmul.f32 1.442695, %v2582_v50  ;;  %v2698_v11 = vsel %vm2101_vm0, %v5927_v29, 0.0 }
 0x40f   : > { %v2628_v30 = vmul.f32 1.442695, %v2575_v63  ;;  %2699 = vadd.xlane.f32.xlu0 %v2698_v11  ;;  %v2550_v41 = vpop.xlane.xlu0 %2549  ;;  %v2731_v15 = vsel %vm2101_vm0, %v5929_v39, 0.0 }
 0x410   : > { %v2547_v32 = vpop.xlane.xlu1 %2546  ;;  %4983 = vpow2.f32 %v2642_v24  ;;  %v2584_v62 = vsub.f32 %v5790_v47, %v2550_v41  ;;  %2732 = vadd.xlane.f32.xlu1 %v2731_v15 }
 0x411   : > { %v2583_v49 = vsub.f32 %v5814_v25, %v2547_v32  ;;  %v5937_v34 = vpop.eup %4971  ;;  %4985 = vpow2.f32 %v2628_v30 }
 0x412   : > { %v5939_v3 = vpop.eup %4973  ;;  %v2646_v16 = vmul.f32 1.442695, %v2584_v62  ;;  %v2722_v8 = vsel %vm2101_vm0, %v5937_v34, 0.0 }
 0x413   : > { %v2644_v45 = vmul.f32 1.442695, %v2583_v49  ;;  %2723 = vadd.xlane.f32.xlu0 %v2722_v8  ;;  %v2701_v19 = vsel %vm2101_vm0, %v5939_v3, 0.0 }
 0x414   : > { %v2553_v58 = vpop.xlane.xlu1 %2552  ;;  %4987 = vpow2.f32 %v2646_v16  ;;  %2702 = vadd.xlane.f32.xlu1 %v2701_v19 }
 0x415   : > { %v2585_v47 = vsub.f32 %v5806_v10, %v2553_v58  ;;  %4989 = vpow2.f32 %v2644_v45 }
 0x416   : > { %v5946_v25 = vpop.eup %4975 }
 0x417   : > { %v5948_v57 = vpop.eup %4977  ;;  %v2648_v37 = vmul.f32 1.442695, %v2585_v47  ;;  %v2725_v42 = vsel %vm2101_vm0, %v5946_v25, 0.0 }
 0x418   : > { %v2716_v38 = vsel %vm2101_vm0, %v5948_v57, 0.0  ;;  %2726 = vadd.xlane.f32.xlu1 %v2725_v42 }
 0x419   : > { %4991 = vpow2.f32 %v2648_v37  ;;  %2717 = vadd.xlane.f32.xlu0 %v2716_v38  ;;  %v5954_v43 = vpop.eup %4979 }
 0x41a   : > { %v5956_v48 = vpop.eup %4981  ;;  %v2710_v10 = vsel %vm2101_vm0, %v5954_v43, 0.0 }
 0x41b   : > { %v2719_v20 = vsel %vm2101_vm0, %v5956_v48, 0.0 }
 0x41c   : > { %2720 = vadd.xlane.f32.xlu1 %v2719_v20 }
 0x41d   : > { %2711 = vadd.xlane.f32.xlu0 %v2710_v10  ;;  %v5962_v55 = vpop.eup %4983 }
 0x41e   : > { %v5964_v0 = vpop.eup %4985  ;;  %v2734_v6 = vsel %vm2101_vm0, %v5962_v55, 0.0 }
 0x41f   : > { %v2713_v14 = vsel %vm2101_vm0, %v5964_v0, 0.0 }
 0x420   : > { %2714 = vadd.xlane.f32.xlu1 %v2713_v14 }
 0x421   : > { %2735 = vadd.xlane.f32.xlu0 %v2734_v6  ;;  %v5970_v2 = vpop.eup %4987 }
 0x422   : > { %v5972_v9 = vpop.eup %4989  ;;  %v2740_v50 = vsel %vm2101_vm0, %v5970_v2, 0.0 }
 0x423   : > { %v2737_v63 = vsel %vm2101_vm0, %v5972_v9, 0.0 }
 0x424   : > { %2738 = vadd.xlane.f32.xlu1 %v2737_v63 }
 0x425   : > { %2741 = vadd.xlane.f32.xlu0 %v2740_v50 }
 0x426   : > { %v5978_v24 = vpop.eup %4991 }
 0x427   : > { %v2743_v30 = vsel %vm2101_vm0, %v5978_v24, 0.0 }
 0x428   : > { %2744 = vadd.xlane.f32.xlu1 %v2743_v30 }
 0x46e   : > { %v2658_v11 = vpop.xlane.xlu0 %2657 }
 0x472   : > { %v2682_v41 = vpop.xlane.xlu0 %2681 }
 0x473   : > { %v2661_v15 = vpop.xlane.xlu1 %2660 }
 0x474   : > { %4993 = vrcp.f32 %v2661_v15 }
 0x476   : > { %v2652_v32 = vpop.xlane.xlu0 %2651 }
 0x477   : > { %v2685_v62 = vpop.xlane.xlu1 %2684  ;;  %4995 = vrcp.f32 %v2652_v32 }
 0x478   : > { %4997 = vrcp.f32 %v2658_v11 }
 0x47a   : > { %v2676_v49 = vpop.xlane.xlu0 %2675 }
 0x47b   : > { %v2655_v16 = vpop.xlane.xlu1 %2654 }
 0x47c   : > { %4999 = vrcp.f32 %v2655_v16 }
 0x47d   : > { %5001 = vrcp.f32 %v2685_v62 }
 0x47e   : > { %5003 = vrcp.f32 %v2676_v49 }
 0x47f   : > { %v2670_v45 = vpop.xlane.xlu0 %2669  ;;  %v2679_v8 = vpop.xlane.xlu1 %2678  ;;  %5005 = vrcp.f32 %v2682_v41 }
 0x480   : > { %5007 = vrcp.f32 %v2679_v8 }
 0x481   : > { %v4994_v47 = vpop.eup %4993  ;;  %5009 = vrcp.f32 %v2670_v45 }
 0x482   : > { %v2781_v6 = vmul.f32 %v4994_v47, %v5839_v22 }
 0x483   : > { %v2694_v19 = vpop.xlane.xlu0 %2693  ;;  %v2673_v58 = vpop.xlane.xlu1 %2672 }
 0x484   : > { %v4996_v37 = vpop.eup %4995  ;;  %5011 = vrcp.f32 %v2673_v58 }
 0x485   : > { %v4998_v10 = vpop.eup %4997  ;;  %v2778_v14 = vmul.f32 %v4996_v37, %v5847_v44  ;;  %v2836_v44 = vpack.c.bf16 %v5690_v36, %v5680_v60  ;;  %v2840_v60 = vpack.c.bf16 %v5692_v21, %v5682_v61  ;;  %v6010_v21 = vld [vmem:[%s5986_s15 + $0x18] sm:$0xff]  }
 0x486   : > { %v2780_v30 = vmul.f32 %v4998_v10, %v5831_v31 }
 0x487   : > { %v2664_v42 = vpop.xlane.xlu0 %2663  ;;  %v2697_v38 = vpop.xlane.xlu1 %2696 }
 0x488   : > { %5013 = vrcp.f32 %v2664_v42  ;;  %v2811_v49 = vpack.c.bf16 %v2781_v6, %v2780_v30 }
 0x489   : > { %v5000_v20 = vpop.eup %4999  ;;  %5015 = vrcp.f32 %v2697_v38 }
 0x48a   : > { %v2779_v50 = vmul.f32 %v5000_v20, %v5859_v5  ;;  %v5002_v63 = vpop.eup %5001 }
 0x48b   : > { %v2688_v11 = vpop.xlane.xlu0 %2687  ;;  %v2667_v41 = vpop.xlane.xlu1 %2666  ;;  %v2789_v22 = vmul.f32 %v5002_v63, %v5849_v13 }
 0x48c   : > { %v5004_v15 = vpop.eup %5003  ;;  %v2810_v32 = vpack.c.bf16 %v2779_v50, %v2778_v14  ;;  %5017 = vrcp.f32 %v2667_v41 }
 0x48d   : > { %v5006_v62 = vpop.eup %5005  ;;  %5019 = vrcp.f32 %v2688_v11  ;;  %v2786_v5 = vmul.f32 %v5004_v15, %v5857_v1  ;;  %v4899_v11 = vld [vmem:[%s5986_s15 + $0x38] sm:$0xff]  }
 0x48e   : > { %v5008_v16 = vpop.eup %5007  ;;  %4591 = vmatprep.mubr.msk.bf16.mxu0 %vm2101_vm0, %v2810_v32  ;;  %5021 = vrcp.f32 %v2694_v19  ;;  %v2788_v8 = vmul.f32 %v5006_v62, %v5837_v59 }
 0x48f   : > { %4592 = vmatmul.mubr.msk.bf16.vlgmr.msra.gmra.mxu0 %vm2101_vm0, %v2811_v49  ;;  %v2691_v31 = vpop.xlane.xlu1 %2690  ;;  %v2787_v45 = vmul.f32 %v5008_v16, %v5866_v46 }
 0x490   : > { %v2706_v58 = vpop.xlane.xlu0 %2705  ;;  %4616 = vmatpush3.bf16.msra.mxu0 %v5684_v17  ;;  %5023 = vrcp.f32 %v2691_v31  ;;  %v2815_v47 = vpack.c.bf16 %v2789_v22, %v2788_v8  ;;  %v5010_v17 = vpop.eup %5009 }
 0x491   : > { %4617 = vmatprep.subr.bf16.mxu0 %v2836_v44  ;;  %v2814_v13 = vpack.c.bf16 %v2787_v45, %v2786_v5  ;;  %v5012_v1 = vpop.eup %5011  ;;  %v2784_v14 = vmul.f32 %v5010_v17, %v5868_v12 }
 0x493   : > { %4607 = vmatprep.mubr.msk.bf16.mxu1 %vm2101_vm0, %v2814_v13 }
 0x494   : > { %v2730_v36 = vpop.xlane.xlu0 %2729  ;;  %4608 = vmatmul.mubr.msk.bf16.vlgmr.msra.gmra.mxu1 %vm2101_vm0, %v2815_v47  ;;  %4618 = vmatpush3.bf16.msra.mxu0 %v2836_v44 }
 0x495   : > { %4632 = vmatpush3.bf16.msra.mxu1 %v5686_v18  ;;  %v2709_v59 = vpop.xlane.xlu1 %2708  ;;  %4619 = vmatprep.subr.bf16.mxu0 %v5672_v51  ;;  %v5014_v46 = vpop.eup %5013  ;;  %v2785_v18 = vmul.f32 %v5012_v1, %v5877_v7 }
 0x496   : > { %4633 = vmatprep.subr.bf16.mxu1 %v2840_v60  ;;  %v5016_v37 = vpop.eup %5015  ;;  %5025 = vrcp.f32 %v2709_v59  ;;  %v2782_v10 = vmul.f32 %v5014_v46, %v5885_v27  ;;  %v4898_v59 = vld [vmem:[%s5986_s15 + $0x10] sm:$0xff]  }
 0x497   : > { %v2793_v30 = vmul.f32 %v5016_v37, %v5887_v35  ;;  %v2813_v27 = vpack.c.bf16 %v2785_v18, %v2784_v14 }
 0x498   : > { %v2700_v19 = vpop.xlane.xlu0 %2699  ;;  %4620 = vmatpush3.bf16.msra.mxu0 %v5672_v51 }
 0x499   : > { %4634 = vmatpush3.bf16.msra.mxu1 %v2840_v60  ;;  %v2733_v61 = vpop.xlane.xlu1 %2732  ;;  %4621 = vmatprep.subr.bf16.mxu0 %v5676_v52  ;;  %v5018_v42 = vpop.eup %5017  ;;  %5027 = vrcp.f32 %v2700_v19 }
 0x49a   : > { %4635 = vmatprep.subr.bf16.mxu1 %v5674_v53  ;;  %v5020_v38 = vpop.eup %5019  ;;  %v2783_v20 = vmul.f32 %v5018_v42, %v5897_v4  ;;  %5029 = vrcp.f32 %v2706_v58 }
 0x49b   : > { %v5022_v6 = vpop.eup %5021  ;;  %v2790_v4 = vmul.f32 %v5020_v38, %v5895_v28 }
 0x49c   : > { %v2724_v51 = vpop.xlane.xlu0 %2723  ;;  %4622 = vmatpush3.bf16.msra.mxu0 %v5676_v52  ;;  %v2812_v7 = vpack.c.bf16 %v2783_v20, %v2782_v10  ;;  %v2792_v12 = vmul.f32 %v5022_v6, %v5875_v56 }
 0x49d   : > { %v5024_v50 = vpop.eup %5023  ;;  %4636 = vmatpush3.bf16.msra.mxu1 %v5674_v53  ;;  %v2703_v63 = vpop.xlane.xlu1 %2702  ;;  %4647 = vmatprep.subr.bf16.mxu0 %v6010_v21 }
 0x49e   : > { %5031 = vrcp.f32 %v2703_v63  ;;  %4637 = vmatprep.subr.bf16.mxu1 %v5678_v54  ;;  %v2791_v52 = vmul.f32 %v5024_v50, %v5905_v40  ;;  %4595 = vmatprep.mubr.msk.bf16.mxu0 %vm2101_vm0, %v2812_v7  ;;  %v2817_v15 = vpack.c.bf16 %v2793_v30, %v2792_v12  ;;  %v4901_v63 = vld [vmem:[%s5986_s15 + $0x30] sm:$0xff]   ;;  %v4903_v7 = vld [vmem:[%s5986_s15 + $0x28] sm:$0xff]   ;;  %v4907_v30 = vld [vmem:[%s5986_s15 + $0x78] sm:$0xff]  }
 0x49f   : > { %5033 = vrcp.f32 %v2733_v61  ;;  %4596 = vmatmul.mubr.msk.bf16.gmra.mxu0 %vm2101_vm0, %v2813_v27 }
 0x4a0   : > { %v2816_v53 = vpack.c.bf16 %v2791_v52, %v2790_v4  ;;  %5035 = vrcp.f32 %v2724_v51 }
 0x4a1   : > { %4638 = vmatpush3.bf16.msra.mxu1 %v5678_v54  ;;  %v2727_v41 = vpop.xlane.xlu1 %2726  ;;  %5037 = vrcp.f32 %v2730_v36 }
 0x4a2   : > { %v2718_v35 = vpop.xlane.xlu0 %2717  ;;  %4611 = vmatprep.mubr.msk.bf16.mxu1 %vm2101_vm0, %v2816_v53  ;;  %4663 = vmatprep.subr.bf16.mxu1 %v4899_v11  ;;  %5039 = vrcp.f32 %v2727_v41 }
 0x4a3   : > { %4612 = vmatmul.mubr.msk.bf16.gmra.mxu1 %vm2101_vm0, %v2817_v15  ;;  %v5026_v56 = vpop.eup %5025  ;;  %v4906_v15 = vld [vmem:[%s5986_s15 + $0x50] sm:$0xff]  }
 0x4a4   : > { %v2797_v22 = vmul.f32 %v5026_v56, %v5919_v33 }
 0x4a5   : > { %v2721_v40 = vpop.xlane.xlu1 %2720 }
 0x4a6   : > { %v2712_v28 = vpop.xlane.xlu0 %2711  ;;  %5041 = vrcp.f32 %v2721_v40  ;;  %v5028_v32 = vpop.eup %5027 }
 0x4a7   : > { %5043 = vrcp.f32 %v2712_v28  ;;  %v5030_v16 = vpop.eup %5029  ;;  %v2794_v44 = vmul.f32 %v5028_v32, %v5927_v29  ;;  %v4908_v32 = vld [vmem:[%s5986_s15 + $0x48] sm:$0xff]  }
 0x4a8   : > { %5045 = vrcp.f32 %v2718_v35  ;;  %v2796_v45 = vmul.f32 %v5030_v16, %v5911_v23  ;;  %v4910_v16 = vld [vmem:[%s5986_s15 + $0x40] sm:$0xff]  }
 0x4a9   : > { %v2715_v49 = vpop.xlane.xlu1 %2714 }
 0x4aa   : > { %v2736_v62 = vpop.xlane.xlu0 %2735  ;;  %5047 = vrcp.f32 %v2715_v49  ;;  %v2819_v36 = vpack.c.bf16 %v2797_v22, %v2796_v45  ;;  %v4909_v49 = vld [vmem:[%s5986_s15 + $0x70] sm:$0xff]   ;;  %v4911_v22 = vld [vmem:[%s5986_s15 + $0x68] sm:$0xff]   ;;  %v4912_v45 = vld [vmem:[%s5986_s15 + $0x60] sm:$0xff]  }
 0x4ab   : > { %v5032_v54 = vpop.eup %5031  ;;  %5049 = vrcp.f32 %v2736_v62 }
 0x4ac   : > { %v2795_v31 = vmul.f32 %v5032_v54, %v5939_v3  ;;  %v5034_v5 = vpop.eup %5033 }
 0x4ad   : > { %v2739_v58 = vpop.xlane.xlu1 %2738  ;;  %v5036_v13 = vpop.eup %5035  ;;  %v2805_v33 = vmul.f32 %v5034_v5, %v5929_v39 }
 0x4ae   : > { %v2742_v8 = vpop.xlane.xlu0 %2741  ;;  %v2818_v47 = vpack.c.bf16 %v2795_v31, %v2794_v44  ;;  %v5038_v60 = vpop.eup %5037  ;;  %5051 = vrcp.f32 %v2739_v58  ;;  %v2802_v23 = vmul.f32 %v5036_v13, %v5937_v34 }
 0x4af   : > { %v5040_v17 = vpop.eup %5039  ;;  %5053 = vrcp.f32 %v2742_v8  ;;  %v2804_v1 = vmul.f32 %v5038_v60, %v5917_v26 }
 0x4b0   : > { %4623 = vmatprep.mubr.msk.bf16.mxu0 %vm2101_vm0, %v2818_v47  ;;  %v2803_v3 = vmul.f32 %v5040_v17, %v5946_v25 }
 0x4b1   : > { %4624 = vmatmul.mubr.msk.bf16.vlgmr.msra.gmra.mxu0 %vm2101_vm0, %v2819_v36  ;;  %v2745_v29 = vpop.xlane.xlu1 %2744  ;;  %v2823_v19 = vpack.c.bf16 %v2805_v33, %v2804_v1 }
 0x4b2   : > { %5055 = vrcp.f32 %v2745_v29  ;;  %4648 = vmatpush3.bf16.msra.mxu0 %v6010_v21  ;;  %v2822_v46 = vpack.c.bf16 %v2803_v3, %v2802_v23 }
 0x4b3   : > { %4649 = vmatprep.subr.bf16.mxu0 %v4898_v59  ;;  %v5042_v37 = vpop.eup %5041 }
 0x4b4   : > { %4639 = vmatprep.mubr.msk.bf16.mxu1 %vm2101_vm0, %v2822_v46  ;;  %v5044_v39 = vpop.eup %5043  ;;  %v2801_v25 = vmul.f32 %v5042_v37, %v5956_v48 }
 0x4b5   : > { %4640 = vmatmul.mubr.msk.bf16.vlgmr.msra.gmra.mxu1 %vm2101_vm0, %v2823_v19  ;;  %v5046_v61 = vpop.eup %5045  ;;  %v2798_v26 = vmul.f32 %v5044_v39, %v5954_v43 }
 0x4b6   : > { %4650 = vmatpush3.bf16.msra.mxu0 %v4898_v59  ;;  %4664 = vmatpush3.bf16.msra.mxu1 %v4899_v11  ;;  %v2800_v18 = vmul.f32 %v5046_v61, %v5948_v57 }
 0x4b7   : > { %v5048_v34 = vpop.eup %5047  ;;  %4665 = vmatprep.subr.bf16.mxu1 %v4901_v63 }
 0x4b8   : > { %v2799_v42 = vmul.f32 %v5048_v34, %v5964_v0  ;;  %v5050_v21 = vpop.eup %5049  ;;  %v2821_v20 = vpack.c.bf16 %v2801_v25, %v2800_v18 }
 0x4b9   : > { %v2806_v51 = vmul.f32 %v5050_v21, %v5962_v55  ;;  %v4900_v55 = vld [vmem:[%s5986_s15 + $0x8] sm:$0xff]  }
 0x4ba   : > { %v2820_v38 = vpack.c.bf16 %v2799_v42, %v2798_v26  ;;  %4651 = vmatprep.subr.bf16.mxu0 %v4900_v55  ;;  %4666 = vmatpush3.bf16.msra.mxu1 %v4901_v63 }
 0x4bb   : > { %v5052_v10 = vpop.eup %5051  ;;  %4652 = vmatpush3.bf16.msra.mxu0 %v4900_v55  ;;  %4667 = vmatprep.subr.bf16.mxu1 %v4903_v7 }
 0x4bc   : > { %v5054_v6 = vpop.eup %5053  ;;  %4627 = vmatprep.mubr.msk.bf16.mxu0 %vm2101_vm0, %v2820_v38  ;;  %v2807_v48 = vmul.f32 %v5052_v10, %v5972_v9  ;;  %v4902_v9 = vld [vmem:[%s5986_s15] sm:$0xff]  }
 0x4bd   : > { %4628 = vmatmul.mubr.msk.bf16.gmra.mxu0 %vm2101_vm0, %v2821_v20  ;;  %v2808_v57 = vmul.f32 %v5054_v6, %v5970_v2  ;;  %4653 = vmatprep.subr.bf16.mxu0 %v4902_v9  ;;  %v4904_v2 = vld [vmem:[%s5986_s15 + $0x20] sm:$0xff]  }
 0x4be   : > { %v2824_v0 = vpack.c.bf16 %v2807_v48, %v2806_v51  ;;  %4668 = vmatpush3.bf16.msra.mxu1 %v4903_v7 }
 0x4bf   : > { %v5056_v43 = vpop.eup %5055  ;;  %4654 = vmatpush3.bf16.msra.mxu0 %v4902_v9  ;;  %4669 = vmatprep.subr.bf16.mxu1 %v4904_v2 }
 0x4c0   : > { %v2809_v14 = vmul.f32 %v5056_v43, %v5978_v24  ;;  %4643 = vmatprep.mubr.msk.bf16.mxu1 %vm2101_vm0, %v2824_v0  ;;  %v4905_v24 = vld [vmem:[%s5986_s15 + $0x58] sm:$0xff]  }
 0x4c1   : > { %4679 = vmatprep.subr.bf16.mxu0 %v4905_v24 }
 0x4c2   : > { %v2825_v50 = vpack.c.bf16 %v2809_v14, %v2808_v57  ;;  %4670 = vmatpush3.bf16.msra.mxu1 %v4904_v2 }
 0x4c3   : > { %4695 = vmatprep.subr.bf16.mxu1 %v4907_v30 }
 0x4c4   : > { %4644 = vmatmul.mubr.msk.bf16.gmra.mxu1 %vm2101_vm0, %v2825_v50 }
 0x54f   : > { %v4593_v27 = vpop.f32.mrf.mxu0 }
 0x551   : > { %v2888_v4 = vpop.f32.mrf.mxu0 }
 0x553   : > { %v4594_v52 = vpop.f32.mrf.mxu0 }
 0x554   : > { %v4609_v11 = vpop.f32.mrf.mxu1  ;;  %v3151_v41 = vpack.c.bf16 %v4594_v52, %v4593_v27 }
 0x555   : > { %v2891_v12 = vpop.f32.mrf.mxu0 }
 0x556   : > { %v3150_v53 = vpack.c.bf16 %v2891_v12, %v2888_v4  ;;  %v2965_v35 = vpop.f32.mrf.mxu1 }
 0x558   : > { %v4610_v28 = vpop.f32.mrf.mxu1  ;;  %4655 = vmatprep.mubr.msk.bf16.mxu0 %vm2101_vm0, %v3150_v53 }
 0x559   : > { %4656 = vmatmul.mubr.msk.bf16.vlgmr.msra.gmra.mxu0 %vm2101_vm0, %v3151_v41  ;;  %v3155_v62 = vpack.c.bf16 %v4610_v28, %v4609_v11 }
 0x55a   : > { %v2968_v40 = vpop.f32.mrf.mxu1  ;;  %4680 = vmatpush3.bf16.msra.mxu0 %v4905_v24 }
 0x55b   : > { %v3154_v56 = vpack.c.bf16 %v2968_v40, %v2965_v35  ;;  %4681 = vmatprep.subr.bf16.mxu0 %v4906_v15 }
 0x55d   : > { %4671 = vmatprep.mubr.msk.bf16.mxu1 %vm2101_vm0, %v3154_v56 }
 0x55e   : > { %4672 = vmatmul.mubr.msk.bf16.vlgmr.msra.gmra.mxu1 %vm2101_vm0, %v3155_v62  ;;  %4682 = vmatpush3.bf16.msra.mxu0 %v4906_v15 }
 0x55f   : > { %4696 = vmatpush3.bf16.msra.mxu1 %v4907_v30  ;;  %4683 = vmatprep.subr.bf16.mxu0 %v4908_v32  ;;  %v4597_v54 = vpop.f32.mrf.mxu0 }
 0x560   : > { %4697 = vmatprep.subr.bf16.mxu1 %v4909_v49 }
 0x561   : > { %v2904_v44 = vpop.f32.mrf.mxu0 }
 0x562   : > { %4684 = vmatpush3.bf16.msra.mxu0 %v4908_v32 }
 0x563   : > { %v4613_v31 = vpop.f32.mrf.mxu1  ;;  %4698 = vmatpush3.bf16.msra.mxu1 %v4909_v49  ;;  %4685 = vmatprep.subr.bf16.mxu0 %v4910_v16  ;;  %v4598_v5 = vpop.f32.mrf.mxu0 }
 0x564   : > { %4699 = vmatprep.subr.bf16.mxu1 %v4911_v22  ;;  %v3153_v60 = vpack.c.bf16 %v4598_v5, %v4597_v54 }
 0x565   : > { %v2981_v8 = vpop.f32.mrf.mxu1  ;;  %v2907_v58 = vpop.f32.mrf.mxu0 }
 0x566   : > { %4686 = vmatpush3.bf16.msra.mxu0 %v4910_v16  ;;  %v3152_v13 = vpack.c.bf16 %v2907_v58, %v2904_v44 }
 0x567   : > { %v4614_v47 = vpop.f32.mrf.mxu1  ;;  %4700 = vmatpush3.bf16.msra.mxu1 %v4911_v22 }
 0x568   : > { %4701 = vmatprep.subr.bf16.mxu1 %v4912_v45  ;;  %4659 = vmatprep.mubr.msk.bf16.mxu0 %vm2101_vm0, %v3152_v13  ;;  %v3157_v17 = vpack.c.bf16 %v4614_v47, %v4613_v31 }
 0x569   : > { %v2984_v36 = vpop.f32.mrf.mxu1  ;;  %4660 = vmatmul.mubr.msk.bf16.gmra.mxu0 %vm2101_vm0, %v3153_v60 }
 0x56a   : > { %v3156_v59 = vpack.c.bf16 %v2984_v36, %v2981_v8 }
 0x56b   : > { %4702 = vmatpush3.bf16.msra.mxu1 %v4912_v45 }
 0x56c   : > { %4675 = vmatprep.mubr.msk.bf16.mxu1 %vm2101_vm0, %v3156_v59 }
 0x56d   : > { %4676 = vmatmul.mubr.msk.bf16.gmra.mxu1 %vm2101_vm0, %v3157_v17 }
 0x571   : > { %v4625_v33 = vpop.f32.mrf.mxu0 }
 0x573   : > { %v3042_v29 = vpop.f32.mrf.mxu0 }
 0x575   : > { %v4626_v23 = vpop.f32.mrf.mxu0  ;;  %v4641_v3 = vpop.f32.mrf.mxu1 }
 0x576   : > { %v3159_v37 = vpack.c.bf16 %v4626_v23, %v4625_v33 }
 0x577   : > { %v3045_v1 = vpop.f32.mrf.mxu0  ;;  %v3119_v19 = vpop.f32.mrf.mxu1 }
 0x578   : > { %v3158_v46 = vpack.c.bf16 %v3045_v1, %v3042_v29 }
 0x579   : > { %v4642_v39 = vpop.f32.mrf.mxu1 }
 0x57a   : > { %4687 = vmatprep.mubr.msk.bf16.mxu0 %vm2101_vm0, %v3158_v46  ;;  %v3163_v25 = vpack.c.bf16 %v4642_v39, %v4641_v3 }
 0x57b   : > { %4688 = vmatmul.mubr.msk.bf16.vlgmr.msra.gmra.mxu0 %vm2101_vm0, %v3159_v37  ;;  %v3122_v61 = vpop.f32.mrf.mxu1 }
 0x57c   : > { %v3162_v34 = vpack.c.bf16 %v3122_v61, %v3119_v19 }
 0x57d   : > { %v4629_v26 = vpop.f32.mrf.mxu0 }
 0x57e   : > { %4703 = vmatprep.mubr.msk.bf16.mxu1 %vm2101_vm0, %v3162_v34 }
 0x57f   : > { %v3058_v42 = vpop.f32.mrf.mxu0  ;;  %4704 = vmatmul.mubr.msk.bf16.vlgmr.msra.gmra.mxu1 %vm2101_vm0, %v3163_v25 }
 0x581   : > { %v4630_v21 = vpop.f32.mrf.mxu0 }
 0x582   : > { %v3161_v20 = vpack.c.bf16 %v4630_v21, %v4629_v26 }
 0x583   : > { %v3061_v18 = vpop.f32.mrf.mxu0 }
 0x584   : > { %v4645_v38 = vpop.f32.mrf.mxu1  ;;  %v3160_v10 = vpack.c.bf16 %v3061_v18, %v3058_v42 }
 0x586   : > { %v3135_v6 = vpop.f32.mrf.mxu1  ;;  %4691 = vmatprep.mubr.msk.bf16.mxu0 %vm2101_vm0, %v3160_v10 }
 0x587   : > { %4692 = vmatmul.mubr.msk.bf16.gmra.mxu0 %vm2101_vm0, %v3161_v20 }
 0x588   : > { %v4646_v51 = vpop.f32.mrf.mxu1 }
 0x589   : > { %v3165_v0 = vpack.c.bf16 %v4646_v51, %v4645_v38 }
 0x58a   : > { %v3138_v48 = vpop.f32.mrf.mxu1 }
 0x58b   : > { %v3164_v43 = vpack.c.bf16 %v3138_v48, %v3135_v6 }
 0x58d   : > { %4707 = vmatprep.mubr.msk.bf16.mxu1 %vm2101_vm0, %v3164_v43 }
 0x58e   : > { %4708 = vmatmul.mubr.msk.bf16.gmra.mxu1 %vm2101_vm0, %v3165_v0 }
 0x619   : > { %v4657_v57 = vpop.f32.mrf.mxu0 }
 0x61b   : > { %v3268_v14 = vpop.f32.mrf.mxu0 }
 0x61d   : > { %v4658_v55 = vpop.f32.mrf.mxu0 }
 0x61e   : > { %v4673_v50 = vpop.f32.mrf.mxu1 }
 0x61f   : > { %v3271_v9 = vpop.f32.mrf.mxu0  ;;  %v3608_v35 = vadd.f32 %v4673_v50, %v4657_v57 }
 0x620   : > { %v3369_v63 = vpop.f32.mrf.mxu1 }
 0x621   : > { %v3602_v28 = vadd.f32 %v3369_v63, %v3268_v14 }
 0x622   : > { %v4674_v7 = vpop.f32.mrf.mxu1 }
 0x623   : > { %v3611_v62 = vadd.f32 %v4674_v7, %v4658_v55 }
 0x624   : > { %v3372_v24 = vpop.f32.mrf.mxu1 }
 0x625   : > { %v3605_v44 = vadd.f32 %v3372_v24, %v3271_v9 }
 0x629   : > { %v4661_v2 = vpop.f32.mrf.mxu0 }
 0x62b   : > { %v3284_v30 = vpop.f32.mrf.mxu0 }
 0x62d   : > { %v4677_v27 = vpop.f32.mrf.mxu1  ;;  %v4662_v4 = vpop.f32.mrf.mxu0 }
 0x62e   : > { %v3620_v59 = vadd.f32 %v4677_v27, %v4661_v2 }
 0x62f   : > { %v3385_v52 = vpop.f32.mrf.mxu1  ;;  %v3287_v11 = vpop.f32.mrf.mxu0 }
 0x630   : > { %v3614_v33 = vadd.f32 %v3385_v52, %v3284_v30 }
 0x631   : > { %v4678_v12 = vpop.f32.mrf.mxu1 }
 0x632   : > { %v3623_v3 = vadd.f32 %v4678_v12, %v4662_v4 }
 0x633   : > { %v3388_v15 = vpop.f32.mrf.mxu1 }
 0x634   : > { %v3617_v39 = vadd.f32 %v3388_v15, %v3287_v11 }
 0x63b   : > { %v4689_v53 = vpop.f32.mrf.mxu0 }
 0x63c   : > { %v3609_v40 = vadd.f32 %v4689_v53, %v3608_v35 }
 0x63d   : > { %v3470_v41 = vpop.f32.mrf.mxu0 }
 0x63e   : > { %v3603_v49 = vadd.f32 %v3602_v28, %v3470_v41 }
 0x63f   : > { %v4690_v56 = vpop.f32.mrf.mxu0  ;;  %v4705_v32 = vpop.f32.mrf.mxu1 }
 0x640   : > { %v3610_v16 = vadd.f32 %v4705_v32, %v3609_v40  ;;  %v3612_v31 = vadd.f32 %v4690_v56, %v3611_v62 }
 0x641   : > { %v3473_v54 = vpop.f32.mrf.mxu0  ;;  %v3571_v22 = vpop.f32.mrf.mxu1 }
 0x642   : > { %v3604_v5 = vadd.f32 %v3603_v49, %v3571_v22  ;;  %v3606_v8 = vadd.f32 %v3605_v44, %v3473_v54 }
 0x643   : > { %v4706_v45 = vpop.f32.mrf.mxu1 }
 0x644   : > { %v3613_v58 = vadd.f32 %v4706_v45, %v3612_v31 }
 0x645   : > { %v3574_v13 = vpop.f32.mrf.mxu1 }
 0x646   : > { %v3607_v47 = vadd.f32 %v3606_v8, %v3574_v13 }
 0x647   : > { %v4693_v60 = vpop.f32.mrf.mxu0 }
 0x648   : > { %v3621_v29 = vadd.f32 %v4693_v60, %v3620_v59 }
 0x649   : > { %v3486_v36 = vpop.f32.mrf.mxu0 }
 0x64a   : > { %v3615_v1 = vadd.f32 %v3614_v33, %v3486_v36 }
 0x64b   : > { %v4694_v17 = vpop.f32.mrf.mxu0 }
 0x64c   : > { %v3624_v61 = vadd.f32 %v4694_v17, %v3623_v3 }
 0x64d   : > { %v3489_v19 = vpop.f32.mrf.mxu0 }
 0x64e   : > { %v4709_v23 = vpop.f32.mrf.mxu1  ;;  %v3618_v26 = vadd.f32 %v3617_v39, %v3489_v19 }
 0x64f   : > { %v3622_v46 = vadd.f32 %v4709_v23, %v3621_v29 }
 0x650   : > { %v3587_v37 = vpop.f32.mrf.mxu1 }
 0x651   : > { %v3616_v34 = vadd.f32 %v3615_v1, %v3587_v37  ;;  %3629 = sbr.rel (%p3979_p0) target bundleno = 1627 (0x65b), region = 52 }
 0x652   : > { %v4710_v25 = vpop.f32.mrf.mxu1 }
 0x653   : > { %v3625_v42 = vadd.f32 %v4710_v25, %v3624_v61 }
 0x654   : > { %v3590_v21 = vpop.f32.mrf.mxu1 }
 0x655   : > { %v3619_v18 = vadd.f32 %v3618_v26, %v3590_v21 }
 0x656   : > { %v5151_v38 = vmov 0.0  }
 0x657   : > { %3630 = vst [vmem:[%s6087_s23] sm:$0xff] %v5151_v38  ;;  %3631 = vst [vmem:[%s6087_s23 + $0x8] sm:$0xff] %v5151_v38 }
 0x658   : > { %3632 = vst [vmem:[%s6087_s23 + $0x10] sm:$0xff] %v5151_v38  ;;  %3633 = vst [vmem:[%s6087_s23 + $0x18] sm:$0xff] %v5151_v38 }
 0x659   : > { %3634 = vst [vmem:[%s6087_s23 + $0x20] sm:$0xff] %v5151_v38  ;;  %3635 = vst [vmem:[%s6087_s23 + $0x28] sm:$0xff] %v5151_v38 }
 0x65a   : > { %3636 = vst [vmem:[%s6087_s23 + $0x30] sm:$0xff] %v5151_v38  ;;  %3637 = vst [vmem:[%s6087_s23 + $0x38] sm:$0xff] %v5151_v38 }
 0x65b PF: > { %s3990_s27 = sshll.u32 %s5137_s28, 10  ;;  %s3676_s19 = sshll.u32 %s6087_s23, 4  ;;  %s6113_s19 = int_to_ptr.vmem [resolvable:$true] %s3676_s19 }
 0x65c   : > { %s6111_s20 = scalar_lea.hbm %s6183_s7, %s3990_s27  ;;  %s6187_s21 = sand.u32 1, %s5125_s25  }
 0x65d   : > { %s6125_s10 = scalar_lea.sflag [#allocation3], %s6187_s21  ;;  %s5057_s16 = scalar_lea.vmem %s6113_s19, 1024 }
 0x65e   : > { %v3638_v10 = vld [vmem:[%s6087_s23] sm:$0xff]  ;;  %v3639_v20 = vld [vmem:[%s6087_s23 + $0x8] sm:$0xff]  ;;  %p5058_p1 = scmp.ne.s32.totalorder %s6113_s19, %s5057_s16  ;;  %s5152_s18 = smov [#allocation2]  }
 0x65f   : > { %v3640_v6 = vld [vmem:[%s6087_s23 + $0x10] sm:$0xff]  ;;  %v3646_v51 = vadd.f32 %v3638_v10, %v3604_v5  ;;  %v3647_v48 = vadd.f32 %v3639_v20, %v3607_v47  ;;  %v3641_v0 = vld [vmem:[%s6087_s23 + $0x18] sm:$0xff]  ;;  %s5061_s22 = sshll.u32 %s5152_s18, 4  ;;  %s5062_s22 = int_to_ptr.vmem [resolvable:$false] %s5061_s22 }
 0x660   : > { %v3648_v43 = vadd.f32 %v3640_v6, %v3610_v16  ;;  %v3642_v57 = vld [vmem:[%s6087_s23 + $0x20] sm:$0xff]  ;;  %v3643_v14 = vld [vmem:[%s6087_s23 + $0x28] sm:$0xff]  ;;  %v3649_v50 = vadd.f32 %v3641_v0, %v3613_v58  ;;  %p5059_p2 = pnand %p5058_p1, %p5244_p3  ;;  %s5063_s15 = scalar_lea.vmem %s5062_s22, 2048 }
 0x661   : > { %v3650_v55 = vadd.f32 %v3642_v57, %v3616_v34  ;;  %v3651_v63 = vadd.f32 %v3643_v14, %v3619_v18  ;;  %v3644_v9 = vld [vmem:[%s6087_s23 + $0x30] sm:$0xff]  ;;  %v3645_v7 = vld [vmem:[%s6087_s23 + $0x38] sm:$0xff]  ;;  %3654 = vst [vmem:[%s6087_s23] sm:$0xff] %v3646_v51  ;;  %3655 = vst [vmem:[%s6087_s23 + $0x8] sm:$0xff] %v3647_v48  ;;  %p5064_p5 = scmp.lt.s32.totalorder %s6113_s19, %s5062_s22  ;;  %p5065_p6 = scmp.lt.s32.totalorder %s5063_s15, %s5057_s16 }
 0x662   : > { %3656 = vst [vmem:[%s6087_s23 + $0x10] sm:$0xff] %v3648_v43  ;;  %v3652_v2 = vadd.f32 %v3644_v9, %v3622_v46  ;;  %v3653_v24 = vadd.f32 %v3645_v7, %v3625_v42  ;;  %3657 = vst [vmem:[%s6087_s23 + $0x18] sm:$0xff] %v3649_v50  ;;  %p5060_p4 = pneg %p5059_p2 }
 0x663   : > { %3658 = vst [vmem:[%s6087_s23 + $0x20] sm:$0xff] %v3650_v55  ;;  %3659 = vst [vmem:[%s6087_s23 + $0x28] sm:$0xff] %v3651_v63  ;;  %p5066_p7 = por %p5065_p6, %p5064_p5 }
 0x664   : > { %3660 = vst [vmem:[%s6087_s23 + $0x30] sm:$0xff] %v3652_v2  ;;  %3661 = vst [vmem:[%s6087_s23 + $0x38] sm:$0xff] %v3653_v24 }
 0x665   : > { %p5067_p8 = pnand %p5066_p7, %p5060_p4 }
 0x667   : > { %5070 = shalt.err (!%p5067_p8)
}
 0x668   : > { %s5071_s23 = scalar_lea.hbm %s6111_s20, 1024  ;;  %s5075_s9 = scalar_lea.hbm %s6183_s7, 2048 }
 0x669   : > { %p5072_p10 = scmp.ne.s32.totalorder %s6111_s20, %s5071_s23  ;;  %p5076_p13 = scmp.lt.s32.totalorder %s6111_s20, %s6183_s7 }
 0x66a   : > { %p5077_p0 = scmp.lt.s32.totalorder %s5075_s9, %s5071_s23 }
 0x66b   : > { %p5073_p11 = pnand %p5072_p10, %p5244_p3 }
 0x66c   : > { %p5078_p1 = por %p5077_p0, %p5076_p13 }
 0x66d   : > { %p5074_p12 = pneg %p5073_p11 }
 0x66f   : > { %p5079_p2 = pnand %p5078_p1, %p5074_p12 }
 0x671   : > { %5082 = shalt.err (!%p5079_p2)
}
 0x672   : > { %s5153_s16 = smov 128   ;;  %s5154_s22 = smov 8  }
 0x673   : > { %4727 = dma.vmem_to_hbm [thread:$0]  (%p5244_p3), %s6113_s19, 1024, %s6111_s20, %s6125_s10, %s5153_s16, %s5153_s16, %s5154_s22  }
 0x674 PF: > { %p4733_p4 = scmp.ge.s32.totalorder %s5149_s8, 2  ;;  %s3691_s15 = sand.u32 1, %s5121_s24  }
 0x675   : > { %s3692_s23 = scalar_lea.sflag [#allocation3], %s3691_s15 }
 0x676   : > { %p4730_p5 = pnand %p4733_p4, %p5254_p9 }
 0x678   : > { %p4731_p6 = pneg %p4730_p5 }
 0x67a   : > { %5116 = dma.done.wait (%p4731_p6), %s3692_s23, 1024  }
 0x67b   : > { %5118 = vsyncadd (%p4731_p6), %s3692_s23, 4294966272  ;;  %s20_s8 = sadd.s32 1, %s5149_s8   ;;  %s6188_s24 = smov %s5125_s25 }
 0x67c   : > { %p17_p7 = scmp.ge.s32.totalorder %s20_s8, 6   ;;  %s6189_s25 = smov %s5129_s26 }
 0x67d   : > { %s6190_s26 = smov %s5262_s17  ;;  %s6191_s27 = smov %s5141_s29 }
 0x67e   : > { %s6192_s28 = smov %s5145_s30  ;;  %s6193_s29 = smov %s6196_s11 }
 0x67f   : > { %s6194_s30 = smov %s6200_s12  ;;  %19 = sbr.rel (!%p17_p7) target bundleno = 5 (0x5), region = 99 }
 0x684   :  { %3697 = vsyncpa [#allocation3], 1 }
 0x685   :  { %3699 = vsyncpa [#allocation3 + $0x1], 1 }

</bundles_post_ra>
